<compile_context>
chip_gen: v7x
topology: tpu7x:2x2x1
jax: 0.10.0
libtpu: 0.0.40
codegen_flags: <defaults>
</compile_context>

<pallas_src>
import jax
import jax.numpy as jnp
from jax import lax
from jax.experimental import pallas as pl
from jax.experimental.pallas import tpu as pltpu

# ---- problem sizes (small, consistent with the module) ----
B = 2              # batch
SEQ = 8            # time steps   -> W after transpose
FEAT = 16          # features     -> H after transpose
H, W = FEAT, SEQ   # 16 x 8
HW = H * W         # 128  (one full lane row per image)
BHW = B * HW       # 256
C1 = 16            # conv1 out channels
C2 = 32            # conv2 out channels
HID = 128          # fc1 hidden
NUM_CLASS = 10
NCPAD = 16         # fc2 out-dim padded to a sublane multiple
EPS = 1e-5

# packed bf16 matrix-slab row offsets (slab shape (MATP_ROWS, 128))
WF2_ROW0 = 0                      # rows 0..15   : fc2 weight, column-major, padded (16,128)
WF1_ROW0 = NCPAD                  # rows 16..143 : fc1 weight, column-major (128, 32)
W2_ROW0 = WF1_ROW0 + HID          # rows 144..431: conv2 taps, tap t -> (32, 16)
MATP_ROWS = W2_ROW0 + 9 * C2      # 432

# packed f32 vector-slab column offsets (slab shape (HID, 16))
COL_W1 = 0        # cols 0..8 : conv1 tap weights (rows 0..15)
COL_S1 = 9        # folded BN1 scale (rows 0..15)
COL_B1 = 10       # folded conv1-bias + BN1 bias
COL_S2 = 11       # folded BN2 scale (rows 0..31)
COL_B2 = 12
COL_BF1 = 13      # fc1 bias (rows 0..127)
COL_BF2 = 14      # fc2 bias (rows 0..9)
VECP_COLS = 16

# tap order t = ky*3 + kx  <->  (dy, dx) = (ky-1, kx-1)
_OFFSETS = tuple((dy, dx) for dy in (-1, 0, 1) for dx in (-1, 0, 1))


# =====================  fused Pallas kernel  =====================

def fused_cnn_kernel(x_ref, vecp_ref, matp_ref, o_ref):
    # x_ref    : (1, BHW)          f32, pixels flattened (b*HW + h*W + w) on the lane axis
    # vecp_ref : (HID, VECP_COLS)  f32, packed per-channel params (COL_* offsets)
    # matp_ref : (MATP_ROWS, 128)  bf16, packed matmul weights (*_ROW0 offsets)
    # o_ref    : (NCPAD, B)        f32, column-major padded probabilities

    # ---- hoisted 3x3 edge masks from a lane iota (one-time VPU work) ----
    lane = lax.broadcasted_iota(jnp.int32, (1, BHW), 1)
    wcol = jnp.bitwise_and(lane, W - 1)                        # pixel column within an image
    hrow = jnp.bitwise_and(jnp.right_shift(lane, 3), H - 1)    # pixel row within an image
    masks = []
    for dy, dx in _OFFSETS:
        ok = ((hrow + dy >= 0) & (hrow + dy < H) &
              (wcol + dx >= 0) & (wcol + dx < W))
        masks.append(ok.astype(jnp.float32))                   # (1, BHW)

    def shifted(v, d, t):
        # v[:, p] -> v[:, p + d], zero outside the image (all rotation wraps are masked).
        if d == 0:
            return v
        return pltpu.roll(v, shift=(-d) % BHW, axis=1) * masks[t]

    # ---- conv1 (1 -> 16, 3x3, pad 1) + BN1 + ReLU : VPU broadcast FMAs ----
    x = x_ref[...]                                             # (1, BHW)
    g16 = vecp_ref[0:C1, :]                                    # (C1, 16): w1 taps | s1 | b1
    acc1 = jnp.zeros((C1, BHW), jnp.float32)
    for t, (dy, dx) in enumerate(_OFFSETS):
        xs = shifted(x, dy * W + dx, t)                        # (1, BHW)
        acc1 = acc1 + g16[:, COL_W1 + t:COL_W1 + t + 1] * xs   # (C1,1)*(1,BHW) -> (C1,BHW)
    h1 = jnp.maximum(acc1 * g16[:, COL_S1:COL_S1 + 1]
                     + g16[:, COL_B1:COL_B1 + 1], 0.0)         # (C1, BHW)

    # ---- conv2 (16 -> 32, 3x3, pad 1) + BN2 + ReLU : 9 accumulating MXU dots, N=256 ----
    acc2 = jnp.zeros((C2, BHW), jnp.float32)
    for t, (dy, dx) in enumerate(_OFFSETS):
        ht = shifted(h1, dy * W + dx, t).astype(jnp.bfloat16)            # (C1, BHW)
        w2t = matp_ref[W2_ROW0 + C2 * t:W2_ROW0 + C2 * (t + 1), 0:C1]    # (C2, C1) bf16
        acc2 = acc2 + jnp.dot(w2t, ht, preferred_element_type=jnp.float32)
    s2 = vecp_ref[0:C2, COL_S2:COL_S2 + 1]
    b2 = vecp_ref[0:C2, COL_B2:COL_B2 + 1]
    y2 = jnp.maximum(acc2 * s2 + b2, 0.0)                      # (C2, BHW)

    # ---- AdaptiveAvgPool2d((1,1)) : per-image 128-lane reduction (XLU) ----
    bcol = lax.broadcasted_iota(jnp.int32, (1, B), 1)
    feat = jnp.zeros((C2, B), jnp.float32)
    for b in range(B):
        fb = jnp.sum(y2[:, b * HW:(b + 1) * HW], axis=1, keepdims=True)  # (C2, 1)
        feat = feat + fb * (bcol == b).astype(jnp.float32)
    feat = feat * (1.0 / HW)                                   # (C2, B), column-major

    # ---- fc1 + ReLU, fc2 + sigmoid (column-major: batch on lanes, no transposes) ----
    wf1 = matp_ref[WF1_ROW0:WF1_ROW0 + HID, 0:C2]              # (HID, C2) bf16
    bf1 = vecp_ref[:, COL_BF1:COL_BF1 + 1]                     # (HID, 1)  f32
    hid = jnp.dot(wf1, feat.astype(jnp.bfloat16),
                  preferred_element_type=jnp.float32) + bf1
    hid = jnp.maximum(hid, 0.0)                                # (HID, B)
    wf2 = matp_ref[WF2_ROW0:WF2_ROW0 + NCPAD, :]               # (NCPAD, HID) bf16
    bf2 = vecp_ref[0:NCPAD, COL_BF2:COL_BF2 + 1]               # (NCPAD, 1)  f32
    z = jnp.dot(wf2, hid.astype(jnp.bfloat16),
                preferred_element_type=jnp.float32) + bf2      # (NCPAD, B)
    o_ref[...] = 1.0 / (1.0 + jnp.exp(-z))                     # exact sigmoid


# =====================  wrapper (JAX glue)  =====================

def _pack_params(p):
    """Fold eval-mode BN into scale/bias and pack all params into 2 slabs (2 DMAs)."""
    s1 = p['g1'] / jnp.sqrt(p['v1'] + EPS)
    b1 = (p['cb1'] - p['m1']) * s1 + p['be1']
    s2 = p['g2'] / jnp.sqrt(p['v2'] + EPS)
    b2 = (p['cb2'] - p['m2']) * s2 + p['be2']

    vecp = jnp.zeros((HID, VECP_COLS), jnp.float32)
    vecp = vecp.at[0:C1, COL_W1:COL_W1 + 9].set(p['w1'].reshape(9, C1).T)   # (16, 9)
    vecp = vecp.at[0:C1, COL_S1].set(s1)
    vecp = vecp.at[0:C1, COL_B1].set(b1)
    vecp = vecp.at[0:C2, COL_S2].set(s2)
    vecp = vecp.at[0:C2, COL_B2].set(b2)
    vecp = vecp.at[:, COL_BF1].set(p['bf1'])
    vecp = vecp.at[0:NUM_CLASS, COL_BF2].set(p['bf2'])

    matp = jnp.zeros((MATP_ROWS, 128), jnp.float32)
    matp = matp.at[WF2_ROW0:WF2_ROW0 + NUM_CLASS, :].set(p['wf2'].T)        # (10, 128)
    matp = matp.at[WF1_ROW0:WF1_ROW0 + HID, 0:C2].set(p['wf1'].T)           # (128, 32)
    w2cm = jnp.transpose(p['w2'].reshape(9, C1, C2), (0, 2, 1))             # (9, C2, C1)
    matp = matp.at[W2_ROW0:W2_ROW0 + 9 * C2, 0:C1].set(w2cm.reshape(9 * C2, C1))
    return vecp, matp.astype(jnp.bfloat16)


def simple_cnn_forward(x, p):
    """x: (B, seq, feat) float32 -> (B, NUM_CLASS) float32."""
    # x.transpose(2,1).unsqueeze(1): NCHW with H = feat, W = seq; flatten to one lane row
    # (layout plumbing only -- index = b*HW + h*W + w).
    xflat = jnp.transpose(x, (0, 2, 1)).reshape(1, BHW)
    vecp, matp = _pack_params(p)

    out = pl.pallas_call(
        fused_cnn_kernel,
        out_shape=jax.ShapeDtypeStruct((NCPAD, B), jnp.float32),
        grid=(1,),
        in_specs=[
            pl.BlockSpec((1, BHW), lambda i: (0, 0)),
            pl.BlockSpec((HID, VECP_COLS), lambda i: (0, 0)),
            pl.BlockSpec((MATP_ROWS, 128), lambda i: (0, 0)),
        ],
        out_specs=pl.BlockSpec((NCPAD, B), lambda i: (0, 0)),
        compiler_params=pltpu.CompilerParams(
            dimension_semantics=("arbitrary",),
            vmem_limit_bytes=8 * 1024 * 1024,   # footprint is ~0.2 MiB; explicit + ample
        ),
    )(xflat, vecp, matp)
    return out[:NUM_CLASS, :].T                 # (B, NUM_CLASS)


# =====================  deterministic parameter init  =====================

def init_params(key):
    ks = jax.random.split(key, 16)
    p = {}
    # conv1: 1 -> 16, 3x3  (stored as (ky, kx, cout) since cin == 1)
    p['w1'] = 0.3 * jax.random.normal(ks[0], (3, 3, C1), jnp.float32)
    p['cb1'] = 0.1 * jax.random.normal(ks[1], (C1,), jnp.float32)
    p['g1'] = 1.0 + 0.1 * jax.random.normal(ks[2], (C1,), jnp.float32)
    p['be1'] = 0.1 * jax.random.normal(ks[3], (C1,), jnp.float32)
    p['m1'] = 0.1 * jax.random.normal(ks[4], (C1,), jnp.float32)
    p['v1'] = 1.0 + 0.5 * jax.random.uniform(ks[5], (C1,), jnp.float32)
    # conv2: 16 -> 32, 3x3  (ky, kx, cin, cout)
    p['w2'] = 0.1 * jax.random.normal(ks[6], (3, 3, C1, C2), jnp.float32)
    p['cb2'] = 0.1 * jax.random.normal(ks[7], (C2,), jnp.float32)
    p['g2'] = 1.0 + 0.1 * jax.random.normal(ks[8], (C2,), jnp.float32)
    p['be2'] = 0.1 * jax.random.normal(ks[9], (C2,), jnp.float32)
    p['m2'] = 0.1 * jax.random.normal(ks[10], (C2,), jnp.float32)
    p['v2'] = 1.0 + 0.5 * jax.random.uniform(ks[11], (C2,), jnp.float32)
    # fc1: 32 -> 128, fc2: 128 -> num_class   (stored as (in, out))
    p['wf1'] = 0.15 * jax.random.normal(ks[12], (C2, HID), jnp.float32)
    p['bf1'] = 0.1 * jax.random.normal(ks[13], (HID,), jnp.float32)
    p['wf2'] = 0.1 * jax.random.normal(ks[14], (HID, NUM_CLASS), jnp.float32)
    p['bf2'] = 0.1 * jax.random.normal(ks[15], (NUM_CLASS,), jnp.float32)
    return p


# =====================  pure-JAX reference (matches PyTorch semantics)  =====================

def reference_forward(x, p):
    xi = jnp.transpose(x, (0, 2, 1))[..., None]               # NHWC: (B, H, W, 1)
    w1 = p['w1'][:, :, None, :]                                # HWIO (3,3,1,16)
    h = lax.conv_general_dilated(xi, w1, (1, 1), 'SAME',
                                 dimension_numbers=('NHWC', 'HWIO', 'NHWC'),
                                 precision=lax.Precision.HIGHEST) + p['cb1']
    h = (h - p['m1']) / jnp.sqrt(p['v1'] + EPS) * p['g1'] + p['be1']
    h = jnp.maximum(h, 0.0)
    h = lax.conv_general_dilated(h, p['w2'], (1, 1), 'SAME',
                                 dimension_numbers=('NHWC', 'HWIO', 'NHWC'),
                                 precision=lax.Precision.HIGHEST) + p['cb2']
    h = (h - p['m2']) / jnp.sqrt(p['v2'] + EPS) * p['g2'] + p['be2']
    h = jnp.maximum(h, 0.0)
    f = jnp.mean(h, axis=(1, 2))                               # (B, 32)
    f = jnp.maximum(f @ p['wf1'] + p['bf1'], 0.0)
    z = f @ p['wf2'] + p['bf2']
    return jax.nn.sigmoid(z)


if __name__ == "__main__":
    key = jax.random.PRNGKey(0)
    pkey, xkey = jax.random.split(key)
    params = init_params(pkey)
    x = jax.random.normal(xkey, (B, SEQ, FEAT), jnp.float32)   # (batch=2, seq=8, feat=16)

    out = jax.jit(simple_cnn_forward)(x, params)
    out = jax.block_until_ready(out)

    ref = reference_forward(x, params)
    assert out.shape == (B, NUM_CLASS), out.shape
    # MXU operands are bf16 (f32 accumulation); expected error is ~1e-3 on sigmoid outputs.
    max_err = float(jnp.max(jnp.abs(out - ref)))
    if not max_err < 2e-2:
        raise AssertionError(f"Pallas output mismatch vs reference, max abs err = {max_err}")
    print("KERNEL_OK")
</pallas_src>

<mosaic_0001>
module attributes {stable_mosaic.version = 11 : i64} {
  func.func @fused_cnn_kernel(%arg0: i32, %arg1: memref<1x256xf32, #tpu.memory_space<vmem>>, %arg2: memref<128x16xf32, #tpu.memory_space<vmem>>, %arg3: memref<432x128xbf16, #tpu.memory_space<vmem>>, %arg4: memref<16x2xf32, #tpu.memory_space<vmem>>) attributes {dimension_semantics = [#tpu.dimension_semantics<arbitrary>], iteration_bounds = array<i64: 1>, scalar_prefetch = 0 : i64, scratch_operands = 0 : i64, tpu.core_type = #tpu.core_type<tc>, window_params = [{pipeline_mode = #tpu.pipeline_mode<synchronous>, transform_indices = @transform_0, window_bounds = array<i64: 1, 256>}, {pipeline_mode = #tpu.pipeline_mode<synchronous>, transform_indices = @transform_1, window_bounds = array<i64: 128, 16>}, {pipeline_mode = #tpu.pipeline_mode<synchronous>, transform_indices = @transform_2, window_bounds = array<i64: 432, 128>}, {pipeline_mode = #tpu.pipeline_mode<synchronous>, transform_indices = @transform_3, window_bounds = array<i64: 16, 2>}]} {
    %0 = tpu.iota {dimensions = array<i32: 1>} : vector<1x256xi32>
    %c7_i32 = arith.constant 7 : i32
    %1 = vector.broadcast %c7_i32 : i32 to vector<1x256xi32>
    %2 = arith.andi %0, %1 : vector<1x256xi32>
    %c3_i32 = arith.constant 3 : i32
    %3 = vector.broadcast %c3_i32 : i32 to vector<1x256xi32>
    %4 = arith.shrsi %0, %3 : vector<1x256xi32>
    %c15_i32 = arith.constant 15 : i32
    %5 = vector.broadcast %c15_i32 : i32 to vector<1x256xi32>
    %6 = arith.andi %4, %5 : vector<1x256xi32>
    %c-1_i32 = arith.constant -1 : i32
    %7 = vector.broadcast %c-1_i32 : i32 to vector<1x256xi32>
    %8 = arith.addi %6, %7 : vector<1x256xi32>
    %c0_i32 = arith.constant 0 : i32
    %9 = vector.broadcast %c0_i32 : i32 to vector<1x256xi32>
    %10 = arith.cmpi sge, %8, %9 : vector<1x256xi32>
    %c-1_i32_0 = arith.constant -1 : i32
    %11 = vector.broadcast %c-1_i32_0 : i32 to vector<1x256xi32>
    %12 = arith.addi %6, %11 : vector<1x256xi32>
    %c16_i32 = arith.constant 16 : i32
    %13 = vector.broadcast %c16_i32 : i32 to vector<1x256xi32>
    %14 = arith.cmpi slt, %12, %13 : vector<1x256xi32>
    %15 = arith.andi %10, %14 : vector<1x256xi1>
    %c-1_i32_1 = arith.constant -1 : i32
    %16 = vector.broadcast %c-1_i32_1 : i32 to vector<1x256xi32>
    %17 = arith.addi %2, %16 : vector<1x256xi32>
    %c0_i32_2 = arith.constant 0 : i32
    %18 = vector.broadcast %c0_i32_2 : i32 to vector<1x256xi32>
    %19 = arith.cmpi sge, %17, %18 : vector<1x256xi32>
    %20 = arith.andi %15, %19 : vector<1x256xi1>
    %c-1_i32_3 = arith.constant -1 : i32
    %21 = vector.broadcast %c-1_i32_3 : i32 to vector<1x256xi32>
    %22 = arith.addi %2, %21 : vector<1x256xi32>
    %c8_i32 = arith.constant 8 : i32
    %23 = vector.broadcast %c8_i32 : i32 to vector<1x256xi32>
    %24 = arith.cmpi slt, %22, %23 : vector<1x256xi32>
    %25 = arith.andi %20, %24 : vector<1x256xi1>
    %26 = arith.extui %25 : vector<1x256xi1> to vector<1x256xi32>
    %27 = arith.sitofp %26 : vector<1x256xi32> to vector<1x256xf32>
    %c-1_i32_4 = arith.constant -1 : i32
    %28 = vector.broadcast %c-1_i32_4 : i32 to vector<1x256xi32>
    %29 = arith.addi %6, %28 : vector<1x256xi32>
    %c0_i32_5 = arith.constant 0 : i32
    %30 = vector.broadcast %c0_i32_5 : i32 to vector<1x256xi32>
    %31 = arith.cmpi sge, %29, %30 : vector<1x256xi32>
    %c-1_i32_6 = arith.constant -1 : i32
    %32 = vector.broadcast %c-1_i32_6 : i32 to vector<1x256xi32>
    %33 = arith.addi %6, %32 : vector<1x256xi32>
    %c16_i32_7 = arith.constant 16 : i32
    %34 = vector.broadcast %c16_i32_7 : i32 to vector<1x256xi32>
    %35 = arith.cmpi slt, %33, %34 : vector<1x256xi32>
    %36 = arith.andi %31, %35 : vector<1x256xi1>
    %c0_i32_8 = arith.constant 0 : i32
    %37 = vector.broadcast %c0_i32_8 : i32 to vector<1x256xi32>
    %38 = arith.addi %2, %37 : vector<1x256xi32>
    %c0_i32_9 = arith.constant 0 : i32
    %39 = vector.broadcast %c0_i32_9 : i32 to vector<1x256xi32>
    %40 = arith.cmpi sge, %38, %39 : vector<1x256xi32>
    %41 = arith.andi %36, %40 : vector<1x256xi1>
    %c0_i32_10 = arith.constant 0 : i32
    %42 = vector.broadcast %c0_i32_10 : i32 to vector<1x256xi32>
    %43 = arith.addi %2, %42 : vector<1x256xi32>
    %c8_i32_11 = arith.constant 8 : i32
    %44 = vector.broadcast %c8_i32_11 : i32 to vector<1x256xi32>
    %45 = arith.cmpi slt, %43, %44 : vector<1x256xi32>
    %46 = arith.andi %41, %45 : vector<1x256xi1>
    %47 = arith.extui %46 : vector<1x256xi1> to vector<1x256xi32>
    %48 = arith.sitofp %47 : vector<1x256xi32> to vector<1x256xf32>
    %c-1_i32_12 = arith.constant -1 : i32
    %49 = vector.broadcast %c-1_i32_12 : i32 to vector<1x256xi32>
    %50 = arith.addi %6, %49 : vector<1x256xi32>
    %c0_i32_13 = arith.constant 0 : i32
    %51 = vector.broadcast %c0_i32_13 : i32 to vector<1x256xi32>
    %52 = arith.cmpi sge, %50, %51 : vector<1x256xi32>
    %c-1_i32_14 = arith.constant -1 : i32
    %53 = vector.broadcast %c-1_i32_14 : i32 to vector<1x256xi32>
    %54 = arith.addi %6, %53 : vector<1x256xi32>
    %c16_i32_15 = arith.constant 16 : i32
    %55 = vector.broadcast %c16_i32_15 : i32 to vector<1x256xi32>
    %56 = arith.cmpi slt, %54, %55 : vector<1x256xi32>
    %57 = arith.andi %52, %56 : vector<1x256xi1>
    %c1_i32 = arith.constant 1 : i32
    %58 = vector.broadcast %c1_i32 : i32 to vector<1x256xi32>
    %59 = arith.addi %2, %58 : vector<1x256xi32>
    %c0_i32_16 = arith.constant 0 : i32
    %60 = vector.broadcast %c0_i32_16 : i32 to vector<1x256xi32>
    %61 = arith.cmpi sge, %59, %60 : vector<1x256xi32>
    %62 = arith.andi %57, %61 : vector<1x256xi1>
    %c1_i32_17 = arith.constant 1 : i32
    %63 = vector.broadcast %c1_i32_17 : i32 to vector<1x256xi32>
    %64 = arith.addi %2, %63 : vector<1x256xi32>
    %c8_i32_18 = arith.constant 8 : i32
    %65 = vector.broadcast %c8_i32_18 : i32 to vector<1x256xi32>
    %66 = arith.cmpi slt, %64, %65 : vector<1x256xi32>
    %67 = arith.andi %62, %66 : vector<1x256xi1>
    %68 = arith.extui %67 : vector<1x256xi1> to vector<1x256xi32>
    %69 = arith.sitofp %68 : vector<1x256xi32> to vector<1x256xf32>
    %c0_i32_19 = arith.constant 0 : i32
    %70 = vector.broadcast %c0_i32_19 : i32 to vector<1x256xi32>
    %71 = arith.addi %6, %70 : vector<1x256xi32>
    %c0_i32_20 = arith.constant 0 : i32
    %72 = vector.broadcast %c0_i32_20 : i32 to vector<1x256xi32>
    %73 = arith.cmpi sge, %71, %72 : vector<1x256xi32>
    %c0_i32_21 = arith.constant 0 : i32
    %74 = vector.broadcast %c0_i32_21 : i32 to vector<1x256xi32>
    %75 = arith.addi %6, %74 : vector<1x256xi32>
    %c16_i32_22 = arith.constant 16 : i32
    %76 = vector.broadcast %c16_i32_22 : i32 to vector<1x256xi32>
    %77 = arith.cmpi slt, %75, %76 : vector<1x256xi32>
    %78 = arith.andi %73, %77 : vector<1x256xi1>
    %c-1_i32_23 = arith.constant -1 : i32
    %79 = vector.broadcast %c-1_i32_23 : i32 to vector<1x256xi32>
    %80 = arith.addi %2, %79 : vector<1x256xi32>
    %c0_i32_24 = arith.constant 0 : i32
    %81 = vector.broadcast %c0_i32_24 : i32 to vector<1x256xi32>
    %82 = arith.cmpi sge, %80, %81 : vector<1x256xi32>
    %83 = arith.andi %78, %82 : vector<1x256xi1>
    %c-1_i32_25 = arith.constant -1 : i32
    %84 = vector.broadcast %c-1_i32_25 : i32 to vector<1x256xi32>
    %85 = arith.addi %2, %84 : vector<1x256xi32>
    %c8_i32_26 = arith.constant 8 : i32
    %86 = vector.broadcast %c8_i32_26 : i32 to vector<1x256xi32>
    %87 = arith.cmpi slt, %85, %86 : vector<1x256xi32>
    %88 = arith.andi %83, %87 : vector<1x256xi1>
    %89 = arith.extui %88 : vector<1x256xi1> to vector<1x256xi32>
    %90 = arith.sitofp %89 : vector<1x256xi32> to vector<1x256xf32>
    %c0_i32_27 = arith.constant 0 : i32
    %91 = vector.broadcast %c0_i32_27 : i32 to vector<1x256xi32>
    %92 = arith.addi %6, %91 : vector<1x256xi32>
    %c0_i32_28 = arith.constant 0 : i32
    %93 = vector.broadcast %c0_i32_28 : i32 to vector<1x256xi32>
    %94 = arith.cmpi sge, %92, %93 : vector<1x256xi32>
    %c0_i32_29 = arith.constant 0 : i32
    %95 = vector.broadcast %c0_i32_29 : i32 to vector<1x256xi32>
    %96 = arith.addi %6, %95 : vector<1x256xi32>
    %c16_i32_30 = arith.constant 16 : i32
    %97 = vector.broadcast %c16_i32_30 : i32 to vector<1x256xi32>
    %98 = arith.cmpi slt, %96, %97 : vector<1x256xi32>
    %99 = arith.andi %94, %98 : vector<1x256xi1>
    %c1_i32_31 = arith.constant 1 : i32
    %100 = vector.broadcast %c1_i32_31 : i32 to vector<1x256xi32>
    %101 = arith.addi %2, %100 : vector<1x256xi32>
    %c0_i32_32 = arith.constant 0 : i32
    %102 = vector.broadcast %c0_i32_32 : i32 to vector<1x256xi32>
    %103 = arith.cmpi sge, %101, %102 : vector<1x256xi32>
    %104 = arith.andi %99, %103 : vector<1x256xi1>
    %c1_i32_33 = arith.constant 1 : i32
    %105 = vector.broadcast %c1_i32_33 : i32 to vector<1x256xi32>
    %106 = arith.addi %2, %105 : vector<1x256xi32>
    %c8_i32_34 = arith.constant 8 : i32
    %107 = vector.broadcast %c8_i32_34 : i32 to vector<1x256xi32>
    %108 = arith.cmpi slt, %106, %107 : vector<1x256xi32>
    %109 = arith.andi %104, %108 : vector<1x256xi1>
    %110 = arith.extui %109 : vector<1x256xi1> to vector<1x256xi32>
    %111 = arith.sitofp %110 : vector<1x256xi32> to vector<1x256xf32>
    %c1_i32_35 = arith.constant 1 : i32
    %112 = vector.broadcast %c1_i32_35 : i32 to vector<1x256xi32>
    %113 = arith.addi %6, %112 : vector<1x256xi32>
    %c0_i32_36 = arith.constant 0 : i32
    %114 = vector.broadcast %c0_i32_36 : i32 to vector<1x256xi32>
    %115 = arith.cmpi sge, %113, %114 : vector<1x256xi32>
    %c1_i32_37 = arith.constant 1 : i32
    %116 = vector.broadcast %c1_i32_37 : i32 to vector<1x256xi32>
    %117 = arith.addi %6, %116 : vector<1x256xi32>
    %c16_i32_38 = arith.constant 16 : i32
    %118 = vector.broadcast %c16_i32_38 : i32 to vector<1x256xi32>
    %119 = arith.cmpi slt, %117, %118 : vector<1x256xi32>
    %120 = arith.andi %115, %119 : vector<1x256xi1>
    %c-1_i32_39 = arith.constant -1 : i32
    %121 = vector.broadcast %c-1_i32_39 : i32 to vector<1x256xi32>
    %122 = arith.addi %2, %121 : vector<1x256xi32>
    %c0_i32_40 = arith.constant 0 : i32
    %123 = vector.broadcast %c0_i32_40 : i32 to vector<1x256xi32>
    %124 = arith.cmpi sge, %122, %123 : vector<1x256xi32>
    %125 = arith.andi %120, %124 : vector<1x256xi1>
    %c-1_i32_41 = arith.constant -1 : i32
    %126 = vector.broadcast %c-1_i32_41 : i32 to vector<1x256xi32>
    %127 = arith.addi %2, %126 : vector<1x256xi32>
    %c8_i32_42 = arith.constant 8 : i32
    %128 = vector.broadcast %c8_i32_42 : i32 to vector<1x256xi32>
    %129 = arith.cmpi slt, %127, %128 : vector<1x256xi32>
    %130 = arith.andi %125, %129 : vector<1x256xi1>
    %131 = arith.extui %130 : vector<1x256xi1> to vector<1x256xi32>
    %132 = arith.sitofp %131 : vector<1x256xi32> to vector<1x256xf32>
    %c1_i32_43 = arith.constant 1 : i32
    %133 = vector.broadcast %c1_i32_43 : i32 to vector<1x256xi32>
    %134 = arith.addi %6, %133 : vector<1x256xi32>
    %c0_i32_44 = arith.constant 0 : i32
    %135 = vector.broadcast %c0_i32_44 : i32 to vector<1x256xi32>
    %136 = arith.cmpi sge, %134, %135 : vector<1x256xi32>
    %c1_i32_45 = arith.constant 1 : i32
    %137 = vector.broadcast %c1_i32_45 : i32 to vector<1x256xi32>
    %138 = arith.addi %6, %137 : vector<1x256xi32>
    %c16_i32_46 = arith.constant 16 : i32
    %139 = vector.broadcast %c16_i32_46 : i32 to vector<1x256xi32>
    %140 = arith.cmpi slt, %138, %139 : vector<1x256xi32>
    %141 = arith.andi %136, %140 : vector<1x256xi1>
    %c0_i32_47 = arith.constant 0 : i32
    %142 = vector.broadcast %c0_i32_47 : i32 to vector<1x256xi32>
    %143 = arith.addi %2, %142 : vector<1x256xi32>
    %c0_i32_48 = arith.constant 0 : i32
    %144 = vector.broadcast %c0_i32_48 : i32 to vector<1x256xi32>
    %145 = arith.cmpi sge, %143, %144 : vector<1x256xi32>
    %146 = arith.andi %141, %145 : vector<1x256xi1>
    %c0_i32_49 = arith.constant 0 : i32
    %147 = vector.broadcast %c0_i32_49 : i32 to vector<1x256xi32>
    %148 = arith.addi %2, %147 : vector<1x256xi32>
    %c8_i32_50 = arith.constant 8 : i32
    %149 = vector.broadcast %c8_i32_50 : i32 to vector<1x256xi32>
    %150 = arith.cmpi slt, %148, %149 : vector<1x256xi32>
    %151 = arith.andi %146, %150 : vector<1x256xi1>
    %152 = arith.extui %151 : vector<1x256xi1> to vector<1x256xi32>
    %153 = arith.sitofp %152 : vector<1x256xi32> to vector<1x256xf32>
    %c1_i32_51 = arith.constant 1 : i32
    %154 = vector.broadcast %c1_i32_51 : i32 to vector<1x256xi32>
    %155 = arith.addi %6, %154 : vector<1x256xi32>
    %c0_i32_52 = arith.constant 0 : i32
    %156 = vector.broadcast %c0_i32_52 : i32 to vector<1x256xi32>
    %157 = arith.cmpi sge, %155, %156 : vector<1x256xi32>
    %c1_i32_53 = arith.constant 1 : i32
    %158 = vector.broadcast %c1_i32_53 : i32 to vector<1x256xi32>
    %159 = arith.addi %6, %158 : vector<1x256xi32>
    %c16_i32_54 = arith.constant 16 : i32
    %160 = vector.broadcast %c16_i32_54 : i32 to vector<1x256xi32>
    %161 = arith.cmpi slt, %159, %160 : vector<1x256xi32>
    %162 = arith.andi %157, %161 : vector<1x256xi1>
    %c1_i32_55 = arith.constant 1 : i32
    %163 = vector.broadcast %c1_i32_55 : i32 to vector<1x256xi32>
    %164 = arith.addi %2, %163 : vector<1x256xi32>
    %c0_i32_56 = arith.constant 0 : i32
    %165 = vector.broadcast %c0_i32_56 : i32 to vector<1x256xi32>
    %166 = arith.cmpi sge, %164, %165 : vector<1x256xi32>
    %167 = arith.andi %162, %166 : vector<1x256xi1>
    %c1_i32_57 = arith.constant 1 : i32
    %168 = vector.broadcast %c1_i32_57 : i32 to vector<1x256xi32>
    %169 = arith.addi %2, %168 : vector<1x256xi32>
    %c8_i32_58 = arith.constant 8 : i32
    %170 = vector.broadcast %c8_i32_58 : i32 to vector<1x256xi32>
    %171 = arith.cmpi slt, %169, %170 : vector<1x256xi32>
    %172 = arith.andi %167, %171 : vector<1x256xi1>
    %173 = arith.extui %172 : vector<1x256xi1> to vector<1x256xi32>
    %174 = arith.sitofp %173 : vector<1x256xi32> to vector<1x256xf32>
    %c0 = arith.constant 0 : index
    %c0_59 = arith.constant 0 : index
    %175 = vector.load %arg1[%c0, %c0_59] : memref<1x256xf32, #tpu.memory_space<vmem>>, vector<1x256xf32>
    %c0_60 = arith.constant 0 : index
    %c0_61 = arith.constant 0 : index
    %176 = vector.load %arg2[%c0_60, %c0_61] : memref<128x16xf32, #tpu.memory_space<vmem>>, vector<16x16xf32>
    %cst = arith.constant 0.000000e+00 : f32
    %177 = vector.broadcast %cst : f32 to vector<16x256xf32>
    %c9_i32 = arith.constant 9 : i32
    %178 = tpu.dynamic_rotate %175 by %c9_i32 dim 1 : vector<1x256xf32>, i32 -> vector<1x256xf32>
    %179 = arith.mulf %178, %27 : vector<1x256xf32>
    %180 = vector.extract_strided_slice %176 {offsets = [0, 0], sizes = [16, 1], strides = [1, 1]} : vector<16x16xf32> to vector<16x1xf32>
    %181 = vector.broadcast %180 : vector<16x1xf32> to vector<16x256xf32>
    %182 = vector.broadcast %179 : vector<1x256xf32> to vector<16x256xf32>
    %183 = arith.mulf %181, %182 : vector<16x256xf32>
    %184 = arith.addf %177, %183 : vector<16x256xf32>
    %c8_i32_62 = arith.constant 8 : i32
    %185 = tpu.dynamic_rotate %175 by %c8_i32_62 dim 1 : vector<1x256xf32>, i32 -> vector<1x256xf32>
    %186 = arith.mulf %185, %48 : vector<1x256xf32>
    %187 = vector.extract_strided_slice %176 {offsets = [0, 1], sizes = [16, 1], strides = [1, 1]} : vector<16x16xf32> to vector<16x1xf32>
    %188 = vector.broadcast %187 : vector<16x1xf32> to vector<16x256xf32>
    %189 = vector.broadcast %186 : vector<1x256xf32> to vector<16x256xf32>
    %190 = arith.mulf %188, %189 : vector<16x256xf32>
    %191 = arith.addf %184, %190 : vector<16x256xf32>
    %c7_i32_63 = arith.constant 7 : i32
    %192 = tpu.dynamic_rotate %175 by %c7_i32_63 dim 1 : vector<1x256xf32>, i32 -> vector<1x256xf32>
    %193 = arith.mulf %192, %69 : vector<1x256xf32>
    %194 = vector.extract_strided_slice %176 {offsets = [0, 2], sizes = [16, 1], strides = [1, 1]} : vector<16x16xf32> to vector<16x1xf32>
    %195 = vector.broadcast %194 : vector<16x1xf32> to vector<16x256xf32>
    %196 = vector.broadcast %193 : vector<1x256xf32> to vector<16x256xf32>
    %197 = arith.mulf %195, %196 : vector<16x256xf32>
    %198 = arith.addf %191, %197 : vector<16x256xf32>
    %c1_i32_64 = arith.constant 1 : i32
    %199 = tpu.dynamic_rotate %175 by %c1_i32_64 dim 1 : vector<1x256xf32>, i32 -> vector<1x256xf32>
    %200 = arith.mulf %199, %90 : vector<1x256xf32>
    %201 = vector.extract_strided_slice %176 {offsets = [0, 3], sizes = [16, 1], strides = [1, 1]} : vector<16x16xf32> to vector<16x1xf32>
    %202 = vector.broadcast %201 : vector<16x1xf32> to vector<16x256xf32>
    %203 = vector.broadcast %200 : vector<1x256xf32> to vector<16x256xf32>
    %204 = arith.mulf %202, %203 : vector<16x256xf32>
    %205 = arith.addf %198, %204 : vector<16x256xf32>
    %206 = vector.extract_strided_slice %176 {offsets = [0, 4], sizes = [16, 1], strides = [1, 1]} : vector<16x16xf32> to vector<16x1xf32>
    %207 = vector.broadcast %206 : vector<16x1xf32> to vector<16x256xf32>
    %208 = vector.broadcast %175 : vector<1x256xf32> to vector<16x256xf32>
    %209 = arith.mulf %207, %208 : vector<16x256xf32>
    %210 = arith.addf %205, %209 : vector<16x256xf32>
    %c255_i32 = arith.constant 255 : i32
    %211 = tpu.dynamic_rotate %175 by %c255_i32 dim 1 : vector<1x256xf32>, i32 -> vector<1x256xf32>
    %212 = arith.mulf %211, %111 : vector<1x256xf32>
    %213 = vector.extract_strided_slice %176 {offsets = [0, 5], sizes = [16, 1], strides = [1, 1]} : vector<16x16xf32> to vector<16x1xf32>
    %214 = vector.broadcast %213 : vector<16x1xf32> to vector<16x256xf32>
    %215 = vector.broadcast %212 : vector<1x256xf32> to vector<16x256xf32>
    %216 = arith.mulf %214, %215 : vector<16x256xf32>
    %217 = arith.addf %210, %216 : vector<16x256xf32>
    %c249_i32 = arith.constant 249 : i32
    %218 = tpu.dynamic_rotate %175 by %c249_i32 dim 1 : vector<1x256xf32>, i32 -> vector<1x256xf32>
    %219 = arith.mulf %218, %132 : vector<1x256xf32>
    %220 = vector.extract_strided_slice %176 {offsets = [0, 6], sizes = [16, 1], strides = [1, 1]} : vector<16x16xf32> to vector<16x1xf32>
    %221 = vector.broadcast %220 : vector<16x1xf32> to vector<16x256xf32>
    %222 = vector.broadcast %219 : vector<1x256xf32> to vector<16x256xf32>
    %223 = arith.mulf %221, %222 : vector<16x256xf32>
    %224 = arith.addf %217, %223 : vector<16x256xf32>
    %c248_i32 = arith.constant 248 : i32
    %225 = tpu.dynamic_rotate %175 by %c248_i32 dim 1 : vector<1x256xf32>, i32 -> vector<1x256xf32>
    %226 = arith.mulf %225, %153 : vector<1x256xf32>
    %227 = vector.extract_strided_slice %176 {offsets = [0, 7], sizes = [16, 1], strides = [1, 1]} : vector<16x16xf32> to vector<16x1xf32>
    %228 = vector.broadcast %227 : vector<16x1xf32> to vector<16x256xf32>
    %229 = vector.broadcast %226 : vector<1x256xf32> to vector<16x256xf32>
    %230 = arith.mulf %228, %229 : vector<16x256xf32>
    %231 = arith.addf %224, %230 : vector<16x256xf32>
    %c247_i32 = arith.constant 247 : i32
    %232 = tpu.dynamic_rotate %175 by %c247_i32 dim 1 : vector<1x256xf32>, i32 -> vector<1x256xf32>
    %233 = arith.mulf %232, %174 : vector<1x256xf32>
    %234 = vector.extract_strided_slice %176 {offsets = [0, 8], sizes = [16, 1], strides = [1, 1]} : vector<16x16xf32> to vector<16x1xf32>
    %235 = vector.broadcast %234 : vector<16x1xf32> to vector<16x256xf32>
    %236 = vector.broadcast %233 : vector<1x256xf32> to vector<16x256xf32>
    %237 = arith.mulf %235, %236 : vector<16x256xf32>
    %238 = arith.addf %231, %237 : vector<16x256xf32>
    %239 = vector.extract_strided_slice %176 {offsets = [0, 9], sizes = [16, 1], strides = [1, 1]} : vector<16x16xf32> to vector<16x1xf32>
    %240 = vector.broadcast %239 : vector<16x1xf32> to vector<16x256xf32>
    %241 = arith.mulf %238, %240 : vector<16x256xf32>
    %242 = vector.extract_strided_slice %176 {offsets = [0, 10], sizes = [16, 1], strides = [1, 1]} : vector<16x16xf32> to vector<16x1xf32>
    %243 = vector.broadcast %242 : vector<16x1xf32> to vector<16x256xf32>
    %244 = arith.addf %241, %243 : vector<16x256xf32>
    %cst_65 = arith.constant 0.000000e+00 : f32
    %245 = vector.broadcast %cst_65 : f32 to vector<16x256xf32>
    %246 = arith.maximumf %244, %245 : vector<16x256xf32>
    %cst_66 = arith.constant 0.000000e+00 : f32
    %247 = vector.broadcast %cst_66 : f32 to vector<32x256xf32>
    %c9_i32_67 = arith.constant 9 : i32
    %248 = tpu.dynamic_rotate %246 by %c9_i32_67 dim 1 : vector<16x256xf32>, i32 -> vector<16x256xf32>
    %249 = vector.broadcast %27 : vector<1x256xf32> to vector<16x256xf32>
    %250 = arith.mulf %248, %249 : vector<16x256xf32>
    %251 = arith.truncf %250 : vector<16x256xf32> to vector<16x256xbf16>
    %c144 = arith.constant 144 : index
    %c0_68 = arith.constant 0 : index
    %252 = vector.load %arg3[%c144, %c0_68] : memref<432x128xbf16, #tpu.memory_space<vmem>>, vector<32x16xbf16>
    %cst_69 = arith.constant dense<0.000000e+00> : vector<32x256xf32>
    %253 = tpu.matmul %252, %251, %cst_69 {dimension_numbers = #tpu.dot_dimension_numbers<[1], [0], [0], [1], [0, 0, 1, 1], [], []>} : vector<32x16xbf16>, vector<16x256xbf16>, vector<32x256xf32> -> vector<32x256xf32>
    %254 = arith.addf %247, %253 : vector<32x256xf32>
    %c8_i32_70 = arith.constant 8 : i32
    %255 = tpu.dynamic_rotate %246 by %c8_i32_70 dim 1 : vector<16x256xf32>, i32 -> vector<16x256xf32>
    %256 = vector.broadcast %48 : vector<1x256xf32> to vector<16x256xf32>
    %257 = arith.mulf %255, %256 : vector<16x256xf32>
    %258 = arith.truncf %257 : vector<16x256xf32> to vector<16x256xbf16>
    %c176 = arith.constant 176 : index
    %c0_71 = arith.constant 0 : index
    %259 = vector.load %arg3[%c176, %c0_71] : memref<432x128xbf16, #tpu.memory_space<vmem>>, vector<32x16xbf16>
    %cst_72 = arith.constant dense<0.000000e+00> : vector<32x256xf32>
    %260 = tpu.matmul %259, %258, %cst_72 {dimension_numbers = #tpu.dot_dimension_numbers<[1], [0], [0], [1], [0, 0, 1, 1], [], []>} : vector<32x16xbf16>, vector<16x256xbf16>, vector<32x256xf32> -> vector<32x256xf32>
    %261 = arith.addf %254, %260 : vector<32x256xf32>
    %c7_i32_73 = arith.constant 7 : i32
    %262 = tpu.dynamic_rotate %246 by %c7_i32_73 dim 1 : vector<16x256xf32>, i32 -> vector<16x256xf32>
    %263 = vector.broadcast %69 : vector<1x256xf32> to vector<16x256xf32>
    %264 = arith.mulf %262, %263 : vector<16x256xf32>
    %265 = arith.truncf %264 : vector<16x256xf32> to vector<16x256xbf16>
    %c208 = arith.constant 208 : index
    %c0_74 = arith.constant 0 : index
    %266 = vector.load %arg3[%c208, %c0_74] : memref<432x128xbf16, #tpu.memory_space<vmem>>, vector<32x16xbf16>
    %cst_75 = arith.constant dense<0.000000e+00> : vector<32x256xf32>
    %267 = tpu.matmul %266, %265, %cst_75 {dimension_numbers = #tpu.dot_dimension_numbers<[1], [0], [0], [1], [0, 0, 1, 1], [], []>} : vector<32x16xbf16>, vector<16x256xbf16>, vector<32x256xf32> -> vector<32x256xf32>
    %268 = arith.addf %261, %267 : vector<32x256xf32>
    %c1_i32_76 = arith.constant 1 : i32
    %269 = tpu.dynamic_rotate %246 by %c1_i32_76 dim 1 : vector<16x256xf32>, i32 -> vector<16x256xf32>
    %270 = vector.broadcast %90 : vector<1x256xf32> to vector<16x256xf32>
    %271 = arith.mulf %269, %270 : vector<16x256xf32>
    %272 = arith.truncf %271 : vector<16x256xf32> to vector<16x256xbf16>
    %c240 = arith.constant 240 : index
    %c0_77 = arith.constant 0 : index
    %273 = vector.load %arg3[%c240, %c0_77] : memref<432x128xbf16, #tpu.memory_space<vmem>>, vector<32x16xbf16>
    %cst_78 = arith.constant dense<0.000000e+00> : vector<32x256xf32>
    %274 = tpu.matmul %273, %272, %cst_78 {dimension_numbers = #tpu.dot_dimension_numbers<[1], [0], [0], [1], [0, 0, 1, 1], [], []>} : vector<32x16xbf16>, vector<16x256xbf16>, vector<32x256xf32> -> vector<32x256xf32>
    %275 = arith.addf %268, %274 : vector<32x256xf32>
    %276 = arith.truncf %246 : vector<16x256xf32> to vector<16x256xbf16>
    %c272 = arith.constant 272 : index
    %c0_79 = arith.constant 0 : index
    %277 = vector.load %arg3[%c272, %c0_79] : memref<432x128xbf16, #tpu.memory_space<vmem>>, vector<32x16xbf16>
    %cst_80 = arith.constant dense<0.000000e+00> : vector<32x256xf32>
    %278 = tpu.matmul %277, %276, %cst_80 {dimension_numbers = #tpu.dot_dimension_numbers<[1], [0], [0], [1], [0, 0, 1, 1], [], []>} : vector<32x16xbf16>, vector<16x256xbf16>, vector<32x256xf32> -> vector<32x256xf32>
    %279 = arith.addf %275, %278 : vector<32x256xf32>
    %c255_i32_81 = arith.constant 255 : i32
    %280 = tpu.dynamic_rotate %246 by %c255_i32_81 dim 1 : vector<16x256xf32>, i32 -> vector<16x256xf32>
    %281 = vector.broadcast %111 : vector<1x256xf32> to vector<16x256xf32>
    %282 = arith.mulf %280, %281 : vector<16x256xf32>
    %283 = arith.truncf %282 : vector<16x256xf32> to vector<16x256xbf16>
    %c304 = arith.constant 304 : index
    %c0_82 = arith.constant 0 : index
    %284 = vector.load %arg3[%c304, %c0_82] : memref<432x128xbf16, #tpu.memory_space<vmem>>, vector<32x16xbf16>
    %cst_83 = arith.constant dense<0.000000e+00> : vector<32x256xf32>
    %285 = tpu.matmul %284, %283, %cst_83 {dimension_numbers = #tpu.dot_dimension_numbers<[1], [0], [0], [1], [0, 0, 1, 1], [], []>} : vector<32x16xbf16>, vector<16x256xbf16>, vector<32x256xf32> -> vector<32x256xf32>
    %286 = arith.addf %279, %285 : vector<32x256xf32>
    %c249_i32_84 = arith.constant 249 : i32
    %287 = tpu.dynamic_rotate %246 by %c249_i32_84 dim 1 : vector<16x256xf32>, i32 -> vector<16x256xf32>
    %288 = vector.broadcast %132 : vector<1x256xf32> to vector<16x256xf32>
    %289 = arith.mulf %287, %288 : vector<16x256xf32>
    %290 = arith.truncf %289 : vector<16x256xf32> to vector<16x256xbf16>
    %c336 = arith.constant 336 : index
    %c0_85 = arith.constant 0 : index
    %291 = vector.load %arg3[%c336, %c0_85] : memref<432x128xbf16, #tpu.memory_space<vmem>>, vector<32x16xbf16>
    %cst_86 = arith.constant dense<0.000000e+00> : vector<32x256xf32>
    %292 = tpu.matmul %291, %290, %cst_86 {dimension_numbers = #tpu.dot_dimension_numbers<[1], [0], [0], [1], [0, 0, 1, 1], [], []>} : vector<32x16xbf16>, vector<16x256xbf16>, vector<32x256xf32> -> vector<32x256xf32>
    %293 = arith.addf %286, %292 : vector<32x256xf32>
    %c248_i32_87 = arith.constant 248 : i32
    %294 = tpu.dynamic_rotate %246 by %c248_i32_87 dim 1 : vector<16x256xf32>, i32 -> vector<16x256xf32>
    %295 = vector.broadcast %153 : vector<1x256xf32> to vector<16x256xf32>
    %296 = arith.mulf %294, %295 : vector<16x256xf32>
    %297 = arith.truncf %296 : vector<16x256xf32> to vector<16x256xbf16>
    %c368 = arith.constant 368 : index
    %c0_88 = arith.constant 0 : index
    %298 = vector.load %arg3[%c368, %c0_88] : memref<432x128xbf16, #tpu.memory_space<vmem>>, vector<32x16xbf16>
    %cst_89 = arith.constant dense<0.000000e+00> : vector<32x256xf32>
    %299 = tpu.matmul %298, %297, %cst_89 {dimension_numbers = #tpu.dot_dimension_numbers<[1], [0], [0], [1], [0, 0, 1, 1], [], []>} : vector<32x16xbf16>, vector<16x256xbf16>, vector<32x256xf32> -> vector<32x256xf32>
    %300 = arith.addf %293, %299 : vector<32x256xf32>
    %c247_i32_90 = arith.constant 247 : i32
    %301 = tpu.dynamic_rotate %246 by %c247_i32_90 dim 1 : vector<16x256xf32>, i32 -> vector<16x256xf32>
    %302 = vector.broadcast %174 : vector<1x256xf32> to vector<16x256xf32>
    %303 = arith.mulf %301, %302 : vector<16x256xf32>
    %304 = arith.truncf %303 : vector<16x256xf32> to vector<16x256xbf16>
    %c400 = arith.constant 400 : index
    %c0_91 = arith.constant 0 : index
    %305 = vector.load %arg3[%c400, %c0_91] : memref<432x128xbf16, #tpu.memory_space<vmem>>, vector<32x16xbf16>
    %cst_92 = arith.constant dense<0.000000e+00> : vector<32x256xf32>
    %306 = tpu.matmul %305, %304, %cst_92 {dimension_numbers = #tpu.dot_dimension_numbers<[1], [0], [0], [1], [0, 0, 1, 1], [], []>} : vector<32x16xbf16>, vector<16x256xbf16>, vector<32x256xf32> -> vector<32x256xf32>
    %307 = arith.addf %300, %306 : vector<32x256xf32>
    %c0_93 = arith.constant 0 : index
    %c11 = arith.constant 11 : index
    %308 = vector.load %arg2[%c0_93, %c11] : memref<128x16xf32, #tpu.memory_space<vmem>>, vector<32x1xf32>
    %c0_94 = arith.constant 0 : index
    %c12 = arith.constant 12 : index
    %309 = vector.load %arg2[%c0_94, %c12] : memref<128x16xf32, #tpu.memory_space<vmem>>, vector<32x1xf32>
    %310 = vector.broadcast %308 : vector<32x1xf32> to vector<32x256xf32>
    %311 = arith.mulf %307, %310 : vector<32x256xf32>
    %312 = vector.broadcast %309 : vector<32x1xf32> to vector<32x256xf32>
    %313 = arith.addf %311, %312 : vector<32x256xf32>
    %cst_95 = arith.constant 0.000000e+00 : f32
    %314 = vector.broadcast %cst_95 : f32 to vector<32x256xf32>
    %315 = arith.maximumf %313, %314 : vector<32x256xf32>
    %316 = tpu.iota {dimensions = array<i32: 1>} : vector<1x2xi32>
    %cst_96 = arith.constant 0.000000e+00 : f32
    %317 = vector.broadcast %cst_96 : f32 to vector<32x2xf32>
    %318 = vector.extract_strided_slice %315 {offsets = [0, 0], sizes = [32, 128], strides = [1, 1]} : vector<32x256xf32> to vector<32x128xf32>
    %cst_97 = arith.constant dense<0.000000e+00> : vector<32xf32>
    %319 = vector.multi_reduction <add>, %318, %cst_97 [1] : vector<32x128xf32> to vector<32xf32>
    %320 = vector.shape_cast %319 : vector<32xf32> to vector<32x1xf32>
    %c0_i32_98 = arith.constant 0 : i32
    %321 = vector.broadcast %c0_i32_98 : i32 to vector<1x2xi32>
    %322 = arith.cmpi eq, %316, %321 : vector<1x2xi32>
    %323 = arith.extui %322 : vector<1x2xi1> to vector<1x2xi32>
    %324 = arith.sitofp %323 : vector<1x2xi32> to vector<1x2xf32>
    %325 = vector.broadcast %320 : vector<32x1xf32> to vector<32x2xf32>
    %326 = vector.broadcast %324 : vector<1x2xf32> to vector<32x2xf32>
    %327 = arith.mulf %325, %326 : vector<32x2xf32>
    %328 = arith.addf %317, %327 : vector<32x2xf32>
    %329 = vector.extract_strided_slice %315 {offsets = [0, 128], sizes = [32, 128], strides = [1, 1]} : vector<32x256xf32> to vector<32x128xf32>
    %cst_99 = arith.constant dense<0.000000e+00> : vector<32xf32>
    %330 = vector.multi_reduction <add>, %329, %cst_99 [1] : vector<32x128xf32> to vector<32xf32>
    %331 = vector.shape_cast %330 : vector<32xf32> to vector<32x1xf32>
    %c1_i32_100 = arith.constant 1 : i32
    %332 = vector.broadcast %c1_i32_100 : i32 to vector<1x2xi32>
    %333 = arith.cmpi eq, %316, %332 : vector<1x2xi32>
    %334 = arith.extui %333 : vector<1x2xi1> to vector<1x2xi32>
    %335 = arith.sitofp %334 : vector<1x2xi32> to vector<1x2xf32>
    %336 = vector.broadcast %331 : vector<32x1xf32> to vector<32x2xf32>
    %337 = vector.broadcast %335 : vector<1x2xf32> to vector<32x2xf32>
    %338 = arith.mulf %336, %337 : vector<32x2xf32>
    %339 = arith.addf %328, %338 : vector<32x2xf32>
    %cst_101 = arith.constant 7.812500e-03 : f32
    %340 = vector.broadcast %cst_101 : f32 to vector<32x2xf32>
    %341 = arith.mulf %339, %340 : vector<32x2xf32>
    %c16 = arith.constant 16 : index
    %c0_102 = arith.constant 0 : index
    %342 = vector.load %arg3[%c16, %c0_102] : memref<432x128xbf16, #tpu.memory_space<vmem>>, vector<128x32xbf16>
    %c0_103 = arith.constant 0 : index
    %c13 = arith.constant 13 : index
    %343 = vector.load %arg2[%c0_103, %c13] : memref<128x16xf32, #tpu.memory_space<vmem>>, vector<128x1xf32>
    %344 = arith.truncf %341 : vector<32x2xf32> to vector<32x2xbf16>
    %cst_104 = arith.constant dense<0.000000e+00> : vector<128x2xf32>
    %345 = tpu.matmul %342, %344, %cst_104 {dimension_numbers = #tpu.dot_dimension_numbers<[1], [0], [0], [1], [0, 0, 1, 1], [], []>} : vector<128x32xbf16>, vector<32x2xbf16>, vector<128x2xf32> -> vector<128x2xf32>
    %346 = vector.broadcast %343 : vector<128x1xf32> to vector<128x2xf32>
    %347 = arith.addf %345, %346 : vector<128x2xf32>
    %cst_105 = arith.constant 0.000000e+00 : f32
    %348 = vector.broadcast %cst_105 : f32 to vector<128x2xf32>
    %349 = arith.maximumf %347, %348 : vector<128x2xf32>
    %c0_106 = arith.constant 0 : index
    %c0_107 = arith.constant 0 : index
    %350 = vector.load %arg3[%c0_106, %c0_107] : memref<432x128xbf16, #tpu.memory_space<vmem>>, vector<16x128xbf16>
    %c0_108 = arith.constant 0 : index
    %c14 = arith.constant 14 : index
    %351 = vector.load %arg2[%c0_108, %c14] : memref<128x16xf32, #tpu.memory_space<vmem>>, vector<16x1xf32>
    %352 = arith.truncf %349 : vector<128x2xf32> to vector<128x2xbf16>
    %cst_109 = arith.constant dense<0.000000e+00> : vector<16x2xf32>
    %353 = tpu.matmul %350, %352, %cst_109 {dimension_numbers = #tpu.dot_dimension_numbers<[1], [0], [0], [1], [0, 0, 1, 1], [], []>} : vector<16x128xbf16>, vector<128x2xbf16>, vector<16x2xf32> -> vector<16x2xf32>
    %354 = vector.broadcast %351 : vector<16x1xf32> to vector<16x2xf32>
    %355 = arith.addf %353, %354 : vector<16x2xf32>
    %cst_110 = arith.constant 0.000000e+00 : f32
    %356 = vector.broadcast %cst_110 : f32 to vector<16x2xf32>
    %357 = arith.subf %356, %355 : vector<16x2xf32>
    %358 = math.exp %357 : vector<16x2xf32>
    %cst_111 = arith.constant 1.000000e+00 : f32
    %359 = vector.broadcast %cst_111 : f32 to vector<16x2xf32>
    %360 = arith.addf %359, %358 : vector<16x2xf32>
    %cst_112 = arith.constant 1.000000e+00 : f32
    %361 = vector.broadcast %cst_112 : f32 to vector<16x2xf32>
    %362 = arith.divf %361, %360 : vector<16x2xf32>
    %c0_113 = arith.constant 0 : index
    %c0_114 = arith.constant 0 : index
    %363 = vector.load %arg4[%c0_113, %c0_114] : memref<16x2xf32, #tpu.memory_space<vmem>>, vector<16x2xf32>
    tpu.vector_store %arg4[%c0_113, %c0_114], %362 {strides = array<i32>} : memref<16x2xf32, #tpu.memory_space<vmem>>, vector<16x2xf32>,
    return
  }
  func.func @transform_0(%arg0: i32) -> (i32, i32) {
    %c0_i32 = arith.constant 0 : i32
    %c0_i32_0 = arith.constant 0 : i32
    %c0_i32_1 = arith.constant 0 : i32
    return %c0_i32, %c0_i32_0 : i32, i32
  }
  func.func @transform_1(%arg0: i32) -> (i32, i32) {
    %c0_i32 = arith.constant 0 : i32
    %c0_i32_0 = arith.constant 0 : i32
    %c0_i32_1 = arith.constant 0 : i32
    return %c0_i32, %c0_i32_0 : i32, i32
  }
  func.func @transform_2(%arg0: i32) -> (i32, i32) {
    %c0_i32 = arith.constant 0 : i32
    %c0_i32_0 = arith.constant 0 : i32
    %c0_i32_1 = arith.constant 0 : i32
    return %c0_i32, %c0_i32_0 : i32, i32
  }
  func.func @transform_3(%arg0: i32) -> (i32, i32) {
    %c0_i32 = arith.constant 0 : i32
    %c0_i32_0 = arith.constant 0 : i32
    %c0_i32_1 = arith.constant 0 : i32
    return %c0_i32, %c0_i32_0 : i32, i32
  }
}

</mosaic_0001>

<bundles_post_ra>
// kernel: simple_cnn_forward.1
= control target key start
LH: loop header
LB: loop body
LE: loop exit
PB: predicated region body
PF: predicated region fallthrough
CT: control target
= control target key end

     0   :  { %v15_v0 = vlaneseq  ;;  %v2077_v1 = vmov 1   ;;  %v2956_v2 = vmov 0   ;;  %s2079_s18 = smov 9   ;;  %v2080_v11 = vmov 2   ;;  %s2082_s19 = smov 7   ;;  %s2950_s1 = inlined_call_operand.vmem [shape: f32[128,16], index: 1, kind: input, shape index: {}]   ;;  %s2951_s0 = inlined_call_operand.vmem [shape: f32[1,256], index: 0, kind: input, shape index: {}]   ;;  %s2952_s2 = inlined_call_operand.vmem [shape: bf16[432,128], index: 2, kind: input, shape index: {}]   ;;  %s2953_s3 = inlined_call_operand.vmem [shape: f32[16,2], index: 3, kind: output, shape index: {}]  }
   0x1   :  { %2012 = vset.pattern.permute.xlu1 %v2077_v1  ;;  %2011 = vset.pattern.permute.xlu0 %v2956_v2  ;;  %v2126_v3 = vld [vmem:[%s2950_s1] sm:$0xff]  ;;  %v2134_v5 = vld [vmem:[%s2950_s1 + $0x8] sm:$0xff]  ;;  %v2083_v12 = vmov 3   ;;  %s2084_s20 = smov 1   ;;  %v2085_v13 = vmov 4   ;;  %v2086_v14 = vmov 5  }
   0x2   :  { %185 = vperm.xlu1 %2012, %v2126_v3   ;;  %151 = vperm.xlu0 %2011, %v2126_v3   ;;  %v131_v4 = vshrl.u32 %v15_v0, 7  ;;  %v126_v6 = vld [vmem:[%s2951_s0] sm:$0x3]  ;;  %s2081_s0 = smov 8   ;;  %v2087_v15 = vmov 6   ;;  %s2088_s21 = smov 121  }
   0x3   :  { %802 = vmatprep.mubr.bf16.mxu0 %v2956_v2  ;;  %543 = vmatprep.mubr.bf16.mxu1 %v2956_v2  ;;  %v2089_v16 = vmov 7   ;;  %s2090_s22 = smov 127   ;;  %v2091_v17 = vmov 8   ;;  %s2092_s23 = smov 119   ;;  %v2093_v18 = vmov 9   ;;  %v2095_v19 = vmov 10  }
   0x4   :  { %v2141_v7 = vsub.s32 0, %v131_v4  ;;  %v136_v8 = vsub.s32 1, %v131_v4  ;;  %s2094_s24 = smov 120   ;;  %v2213_v27 = vand.u32 127, %v15_v0  ;;  %v2958_v62 = vmov 0.0  }
   0x6   :  { %189 = vperm.xlu1 %2012, %v2134_v5   ;;  %156 = vperm.xlu0 %2011, %v2134_v5   ;;  %v2145_v9 = vrot.slane %v126_v6, %v136_v8  ;;  %v2148_v10 = vrot.slane %v126_v6, %v2141_v7  ;;  %v17_v30 = vadd.s32 128, %v2213_v27  ;;  %v20_v32 = vshra.s32 %v2213_v27, 3 }
   0x7   :  { %v18_v39 = vand.u32 7, %v2213_v27 }
   0x8   :  { %v21_v34 = vshra.s32 %v17_v30, 3  ;;  %v22_v35 = vand.u32 15, %v20_v32  ;;  %v19_v40 = vand.u32 7, %v17_v30 }
   0x9   :  { %v2230_v44 = vadd.s32 4294967295, %v18_v39  ;;  %v2236_v48 = vadd.s32 1, %v18_v39 }
   0xa   :  { %142 = vrot.lane.b32.xlu1 %v2145_v9, %s2079_s18  ;;  %140 = vrot.lane.b32.xlu0 %v2148_v10, %s2079_s18  ;;  %v23_v37 = vand.u32 15, %v21_v34  ;;  %v24_v41 = vadd.s32 4294967295, %v22_v35  ;;  %v2232_v46 = vadd.s32 4294967295, %v19_v40  ;;  %v2250_v52 = vadd.s32 1, %v19_v40 }
   0xb   :  { %2014 = vset.pattern.permute.xlu1 %v2080_v11  ;;  %2013 = vset.pattern.permute.xlu0 %v2080_v11  ;;  %vm34_vm5 = vcmp.ge.s32.totalorder %v2230_v44, 0  ;;  %vm64_vm8 = vcmp.lt.s32.totalorder %v2236_v48, 8  ;;  %vm72_vm10 = vcmp.ge.s32.totalorder %v22_v35, 0  ;;  %vm74_vm11 = vcmp.lt.s32.totalorder %v22_v35, 16 }
   0xc   :  { %v25_v43 = vadd.s32 4294967295, %v23_v37  ;;  %vm26_vm0 = vcmp.ge.s32.totalorder %v24_v41, 0  ;;  %vm28_vm1 = vcmp.lt.s32.totalorder %v24_v41, 16  ;;  %vm35_vm7 = vcmp.ge.s32.totalorder %v2232_v46, 0 }
   0xd   :  { %vm2238_vm4 = vmand %vm26_vm0, %vm28_vm1  ;;  %vm73_vm13 = vcmp.ge.s32.totalorder %v23_v37, 0  ;;  %vm75_vm14 = vcmp.lt.s32.totalorder %v23_v37, 16  ;;  %vm65_vm15 = vcmp.lt.s32.totalorder %v2250_v52, 8  ;;  %v94_v57 = vadd.s32 1, %v22_v35 }
   0xe   :  { %177 = vrot.lane.b32.xlu1 %v2145_v9, %s2081_s0  ;;  %175 = vrot.lane.b32.xlu0 %v2148_v10, %s2081_s0  ;;  %vm27_vm2 = vcmp.ge.s32.totalorder %v25_v43, 0  ;;  %vm29_vm3 = vcmp.lt.s32.totalorder %v25_v43, 16  ;;  %vm2259_vm9 = vmand %vm2238_vm4, %vm34_vm5  ;;  %vm2955_vm1 = vcmp.lt.s32.totalorder %v2213_v27, 8  ;;  %v95_v61 = vadd.s32 1, %v23_v37 }
   0xf   :  { %vm2245_vm6 = vmand %vm27_vm2, %vm29_vm3  ;;  %vm2954_vm3 = vcmp.lt.s32.totalorder %v2213_v27, 9  ;;  %v2293_v63 = vsel %vm2238_vm4, 1.0, %v2958_v62 }
  0x10   :  { %vm2267_vm12 = vmand %vm2245_vm6, %vm35_vm7  ;;  %v2298_v0 = vsel %vm2245_vm6, 1.0, %v2958_v62 }
  0x11   :  { %vm2276_vm0 = vmand %vm2238_vm4, %vm64_vm8  ;;  %v2312_v4 = vsel %vm2267_vm12, 1.0, %v2958_v62  ;;  %vm98_vm12 = vcmp.lt.s32.totalorder %v94_v57, 16 }
  0x12   :  { %222 = vperm.xlu1 %2014, %v2134_v5   ;;  %218 = vperm.xlu0 %2013, %v2126_v3   ;;  %vm2281_vm2 = vmand %vm72_vm10, %vm74_vm11  ;;  %vm212_vm11 = vcmp.lt.s32.totalorder %v2213_v27, 7 }
  0x13   :  { %vm2300_vm10 = vmand %vm73_vm13, %vm75_vm14  ;;  %vm97_vm14 = vcmp.ge.s32.totalorder %v95_v61, 0 }
  0x14   :  { %vm67_vm4 = vmand %vm2245_vm6, %vm65_vm15  ;;  %vm96_vm6 = vcmp.ge.s32.totalorder %v94_v57, 0 }
  0x15   :  { %vm2348_vm13 = vmand %vm2300_vm10, %vm35_vm7 }
  0x16   :  { %208 = vrot.lane.b32.xlu1 %v2148_v10, %s2082_s19  ;;  %210 = vrot.lane.b32.xlu0 %v2145_v9, %s2082_s19  ;;  %v2390_v34 = vsel %vm2348_vm13, 1.0, %v2958_v62 }
  0x17   :  { %2015 = vset.pattern.permute.xlu1 %v2083_v12  ;;  %2016 = vset.pattern.permute.xlu0 %v2083_v12 }
  0x1a   :  { %251 = vperm.xlu1 %2015, %v2126_v3   ;;  %255 = vperm.xlu0 %2016, %v2134_v5  }
  0x1e   :  { %241 = vrot.lane.b32.xlu1 %v2148_v10, %s2084_s20  ;;  %2017 = vset.pattern.permute.xlu0 %v2085_v13 }
  0x1f   :  { %2018 = vset.pattern.permute.xlu1 %v2085_v13  ;;  %275 = vperm.xlu0 %2017, %v2126_v3  }
  0x22   :  { %243 = vrot.lane.b32.xlu1 %v2145_v9, %s2084_s20 }
  0x23   :  { %2020 = vset.pattern.permute.xlu0 %v2086_v14 }
  0x24   :  { %304 = vperm.xlu0 %2020, %v2134_v5  }
  0x26   :  { %279 = vperm.xlu1 %2018, %v2134_v5  }
  0x28   :  { %2021 = vset.pattern.permute.xlu0 %v2087_v15 }
  0x29   :  { %333 = vperm.xlu0 %2021, %v2126_v3  }
  0x2a   :  { %2019 = vset.pattern.permute.xlu1 %v2086_v14 }
  0x2b   :  { %300 = vperm.xlu1 %2019, %v2126_v3  }
  0x2d   :  { %325 = vrot.lane.b32.xlu0 %v2145_v9, %s2088_s21 }
  0x2e   :  { %2024 = vset.pattern.permute.xlu0 %v2089_v16 }
  0x2f   :  { %290 = vrot.lane.b32.xlu1 %v2148_v10, %s2090_s22 }
  0x30   :  { %2022 = vset.pattern.permute.xlu1 %v2087_v15 }
  0x31   :  { %370 = vperm.xlu0 %2024, %v2134_v5  }
  0x33   :  { %292 = vrot.lane.b32.xlu1 %v2145_v9, %s2090_s22 }
  0x35   :  { %2025 = vset.pattern.permute.xlu0 %v2091_v17 }
  0x36   :  { %399 = vperm.xlu0 %2025, %v2126_v3  }
  0x37   :  { %337 = vperm.xlu1 %2022, %v2134_v5  }
  0x3a   :  { %391 = vrot.lane.b32.xlu0 %v2145_v9, %s2092_s23 }
  0x3b   :  { %323 = vrot.lane.b32.xlu1 %v2148_v10, %s2088_s21  ;;  %2028 = vset.pattern.permute.xlu0 %v2093_v18 }
  0x3c   :  { %2023 = vset.pattern.permute.xlu1 %v2089_v16 }
  0x3e   :  { %427 = vperm.xlu0 %2028, %v2134_v5  }
  0x3f   :  { %366 = vperm.xlu1 %2023, %v2126_v3  }
  0x43   :  { %356 = vrot.lane.b32.xlu1 %v2148_v10, %s2094_s24 }
  0x44   :  { %2026 = vset.pattern.permute.xlu1 %v2091_v17  ;;  %v2355_v17 = vsel %vm67_vm4, 1.0, %v2958_v62  ;;  %vm2376_vm4 = vmand %vm96_vm6, %vm98_vm12  ;;  %vm327_vm12 = vcmp.lt.s32.totalorder %v2213_v27, 121 }
  0x45   :  { %vm2416_vm6 = vmand %vm2376_vm4, %vm34_vm5 }
  0x46   :  { %v2447_v1 = vsel %vm2416_vm6, 1.0, %v2958_v62 }
  0x47   :  { %358 = vrot.lane.b32.xlu1 %v2145_v9, %s2094_s24 }
  0x4b   :  { %403 = vperm.xlu1 %2026, %v2134_v5  }
  0x4f   :  { %389 = vrot.lane.b32.xlu1 %v2148_v10, %s2092_s23 }
  0x50   :  { %2027 = vset.pattern.permute.xlu1 %v2093_v18 }
  0x53   :  { %423 = vperm.xlu1 %2027, %v2126_v3  }
  0x57   :  { %2029 = vset.pattern.permute.xlu1 %v2095_v19 }
  0x58   :  { %435 = vperm.xlu1 %2029, %v2126_v3   ;;  %v2307_v3 = vsel %vm2259_vm9, 1.0, %v2958_v62  ;;  %vm2332_vm9 = vmand %vm2281_vm2, %vm34_vm5 }
  0x59   :  { %v2385_v32 = vsel %vm2332_vm9, 1.0, %v2958_v62  ;;  %vm89_vm9 = vmand %vm2300_vm10, %vm65_vm15  ;;  %vm294_vm10 = vcmp.lt.s32.totalorder %v2213_v27, 127 }
  0x5a   :  { %v2437_v55 = vsel %vm89_vm9, 1.0, %v2958_v62 }
  0x5c   :  { %439 = vperm.xlu1 %2029, %v2134_v5   ;;  %v2321_v5 = vsel %vm2276_vm0, 1.0, %v2958_v62  ;;  %vm99_vm0 = vcmp.lt.s32.totalorder %v95_v61, 16 }
  0x81   :  { %v2200_v20 = vpop.permute.xlu1 %185  ;;  %v2204_v22 = vpop.permute.xlu0 %151 }
  0x85   :  { %v2202_v21 = vpop.permute.xlu1 %189  ;;  %v2208_v24 = vpop.permute.xlu0 %156 }
  0x89   :  { %v2206_v23 = vpop.permute.xlu1 %142  ;;  %v2215_v28 = vpop.permute.xlu0 %140 }
  0x8a   :  { %v145_v12 = vsel %vm2954_vm3, %v2215_v28, %v2206_v23  ;;  %v146_v13 = vsel %vm2954_vm3, %v2206_v23, %v2215_v28  ;;  %vm245_vm3 = vcmp.lt.s32.totalorder %v2213_v27, 1 }
  0x8d   :  { %v178_v25 = vpop.permute.xlu1 %177  ;;  %v176_v31 = vpop.permute.xlu0 %175 }
  0x8e   :  { %v180_v6 = vsel %vm2955_vm1, %v176_v31, %v178_v25  ;;  %v181_v8 = vsel %vm2955_vm1, %v178_v25, %v176_v31  ;;  %vm2368_vm1 = vmand %vm2281_vm2, %vm64_vm8  ;;  %v148_v31 = vmul.f32 %v2312_v4, %v145_v12 }
  0x8f   :  { %v182_v25 = vmul.f32 %v2293_v63, %v181_v8  ;;  %v183_v28 = vmul.f32 %v2298_v0, %v180_v6  ;;  %vm2392_vm2 = vmand %vm97_vm14, %vm99_vm0  ;;  %v2455_v8 = vsel %vm2376_vm4, 1.0, %v2958_v62 }
  0x90   :  { %vm103_vm5 = vmand %vm2392_vm2, %vm35_vm7  ;;  %v166_v57 = vrot.slane %v148_v31, %v2141_v7  ;;  %v2460_v11 = vsel %vm2392_vm2, 1.0, %v2958_v62  ;;  %vm360_vm7 = vcmp.lt.s32.totalorder %v2213_v27, 120 }
  0x91   :  { %v2210_v26 = vpop.permute.xlu1 %222  ;;  %v2225_v38 = vpop.permute.xlu0 %218  ;;  %v195_v49 = vrot.slane %v182_v25, %v2141_v7  ;;  %v199_v51 = vrot.slane %v183_v28, %v2141_v7  ;;  %v2450_v6 = vsel %vm103_vm5, 1.0, %v2958_v62  ;;  %vm121_vm13 = vmand %vm2392_vm2, %vm65_vm15  ;;  %vm504_vm15 = vcmask 130048  }
  0x92   :  { %vm2994_vm2 = vcmp.lt.s32.totalorder %v2213_v27, 9  ;;  %vm1401_vm5 = vcmp.eq.s32.totalorder %v2213_v27, 1 }
  0x93   :  { %v200_v12 = vmul.f32 %v195_v49, %v2200_v20  ;;  %v202_v14 = vmul.f32 %v195_v49, %v2202_v21  ;;  %vm2995_vm9 = vmmov %vm2994_vm2 }
  0x94   :  { %vm2996_vm6 = vmmov %vm2994_vm2 }
  0x95   :  { %v2217_v29 = vpop.permute.xlu1 %208  ;;  %v211_v45 = vpop.permute.xlu0 %210 }
  0x96   :  { %v213_v18 = vsel %vm212_vm11, %v2217_v29, %v211_v45  ;;  %v214_v19 = vsel %vm212_vm11, %v211_v45, %v2217_v29  ;;  %v147_v29 = vmul.f32 %v2307_v3, %v146_v13  ;;  %v201_v13 = vmul.f32 %v199_v51, %v2200_v20 }
  0x97   :  { %v215_v37 = vmul.f32 %v2321_v5, %v214_v19  ;;  %v216_v39 = vmul.f32 %v2355_v17, %v213_v18  ;;  %v203_v18 = vmul.f32 %v199_v51, %v2202_v21 }
  0x98   :  { %v162_v56 = vrot.slane %v147_v29, %v2141_v7  ;;  %v170_v29 = vmul.f32 %v166_v57, %v2208_v24 }
  0x99   :  { %v2221_v33 = vpop.permute.xlu1 %251  ;;  %v2243_v50 = vpop.permute.xlu0 %255  ;;  %v228_v58 = vrot.slane %v215_v37, %v2141_v7  ;;  %v232_v46 = vrot.slane %v216_v39, %v2141_v7 }
  0x9a   :  { %v169_v20 = vmul.f32 %v162_v56, %v2208_v24 }
  0x9b   :  { %v235_v21 = vmul.f32 %v228_v58, %v2210_v26  ;;  %v236_v31 = vmul.f32 %v232_v46, %v2210_v26  ;;  %v233_v45 = vmul.f32 %v228_v58, %v2225_v38  ;;  %v234_v49 = vmul.f32 %v232_v46, %v2225_v38 }
  0x9d   :  { %v2223_v36 = vpop.permute.xlu1 %241 }
  0x9e   :  { %v2285_v59 = vpop.permute.xlu0 %275 }
  0xa1   :  { %v2228_v42 = vpop.permute.xlu1 %243 }
  0xa2   :  { %v246_v40 = vsel %vm245_vm3, %v2223_v36, %v2228_v42  ;;  %v247_v41 = vsel %vm245_vm3, %v2228_v42, %v2223_v36  ;;  %v2425_v36 = vsel %vm2368_vm1, 1.0, %v2958_v62  ;;  %vm2515_vm1 = vmand %vm2376_vm4, %vm64_vm8  ;;  %vm393_vm8 = vcmp.lt.s32.totalorder %v2213_v27, 119 }
  0xa3   :  { %v2352_v15 = vpop.permute.xlu0 %304  ;;  %v248_v44 = vmul.f32 %v2385_v32, %v247_v41  ;;  %v249_v54 = vmul.f32 %v2390_v34, %v246_v40  ;;  %v167_v40 = vmul.f32 %v162_v56, %v2204_v22  ;;  %v168_v41 = vmul.f32 %v166_v57, %v2204_v22 }
  0xa5   :  { %v2234_v47 = vpop.permute.xlu1 %279  ;;  %v261_v19 = vrot.slane %v248_v44, %v2141_v7  ;;  %v265_v23 = vrot.slane %v249_v54, %v2141_v7  ;;  %v204_v44 = vadd.f32 %v200_v12, %v167_v40  ;;  %v205_v54 = vadd.f32 %v201_v13, %v168_v41 }
  0xa7   :  { %v266_v26 = vmul.f32 %v261_v19, %v2221_v33  ;;  %v267_v2 = vmul.f32 %v265_v23, %v2221_v33  ;;  %v268_v46 = vmul.f32 %v261_v19, %v2243_v50  ;;  %v237_v12 = vadd.f32 %v233_v45, %v204_v44 }
  0xa8   :  { %v2428_v42 = vpop.permute.xlu0 %333  ;;  %v238_v13 = vadd.f32 %v234_v49, %v205_v54  ;;  %v283_v33 = vmul.f32 %v2285_v59, %v2145_v9  ;;  %v2988_v44 = vmov 0.0  }
  0xa9   :  { %v2536_v52 = vsel %vm2515_vm1, 1.0, %v2988_v44  ;;  %v2539_v35 = vsel %vm121_vm13, 1.0, %v2988_v44  ;;  %vm1785_vm1 = vcmask 15360  }
  0xaa   :  { %v2253_v53 = vpop.permute.xlu1 %300 }
  0xac   :  { %v326_v37 = vpop.permute.xlu0 %325 }
  0xae   :  { %v2287_v60 = vpop.permute.xlu1 %290 }
  0xb0   :  { %v371_v57 = vpop.permute.xlu0 %370 }
  0xb2   :  { %v293_v16 = vpop.permute.xlu1 %292 }
  0xb3   :  { %v295_v25 = vsel %vm294_vm10, %v2287_v60, %v293_v16  ;;  %v296_v28 = vsel %vm294_vm10, %v293_v16, %v2287_v60  ;;  %v206_v60 = vadd.f32 %v202_v14, %v169_v20  ;;  %v207_v16 = vadd.f32 %v203_v18, %v170_v29 }
  0xb4   :  { %v297_v51 = vmul.f32 %v2425_v36, %v295_v25  ;;  %v298_v24 = vmul.f32 %v2437_v55, %v296_v28  ;;  %v269_v14 = vmul.f32 %v265_v23, %v2243_v50  ;;  %v282_v18 = vmul.f32 %v2285_v59, %v2148_v10 }
  0xb5   :  { %v239_v62 = vadd.f32 %v235_v21, %v206_v60  ;;  %v240_v56 = vadd.f32 %v236_v31, %v207_v16  ;;  %v270_v20 = vadd.f32 %v266_v26, %v237_v12  ;;  %v284_v50 = vmul.f32 %v2234_v47, %v2148_v10 }
  0xb6   :  { %v2410_v43 = vpop.permute.xlu1 %337  ;;  %v310_v25 = vrot.slane %v297_v51, %v2141_v7  ;;  %v314_v28 = vrot.slane %v298_v24, %v2141_v7  ;;  %v285_v23 = vmul.f32 %v2234_v47, %v2145_v9  ;;  %v400_v47 = vpop.permute.xlu0 %399 }
  0xb7   :  { %v272_v31 = vadd.f32 %v268_v46, %v239_v62  ;;  %v286_v48 = vadd.f32 %v282_v18, %v270_v20 }
  0xb8   :  { %v315_v10 = vmul.f32 %v310_v25, %v2253_v53  ;;  %v316_v9 = vmul.f32 %v314_v28, %v2253_v53  ;;  %v317_v60 = vmul.f32 %v310_v25, %v2352_v15  ;;  %v318_v53 = vmul.f32 %v314_v28, %v2352_v15 }
  0xb9   :  { %v288_v54 = vadd.f32 %v284_v50, %v272_v31 }
  0xba   :  { %v324_v61 = vpop.permute.xlu1 %323 }
  0xbb   :  { %v328_v22 = vsel %vm327_vm12, %v324_v61, %v326_v37  ;;  %v329_v38 = vsel %vm327_vm12, %v326_v37, %v324_v61  ;;  %v271_v61 = vadd.f32 %v267_v2, %v238_v13  ;;  %v273_v37 = vadd.f32 %v269_v14, %v240_v56 }
  0xbc   :  { %v330_v29 = vmul.f32 %v2447_v1, %v328_v22  ;;  %v331_v19 = vmul.f32 %v2450_v6, %v329_v38  ;;  %v319_v56 = vadd.f32 %v315_v10, %v286_v48  ;;  %v321_v14 = vadd.f32 %v317_v60, %v288_v54 }
  0xbd   :  { %v287_v30 = vadd.f32 %v283_v33, %v271_v61  ;;  %v289_v26 = vadd.f32 %v285_v23, %v273_v37  ;;  %v392_v33 = vpop.permute.xlu0 %391 }
  0xbe   :  { %v2479_v39 = vpop.permute.xlu1 %366  ;;  %v343_v45 = vrot.slane %v330_v29, %v2141_v7  ;;  %v347_v49 = vrot.slane %v331_v19, %v2141_v7 }
  0xbf   :  { %v320_v22 = vadd.f32 %v316_v9, %v287_v30  ;;  %v322_v12 = vadd.f32 %v318_v53, %v289_v26 }
  0xc0   :  { %v348_v15 = vmul.f32 %v343_v45, %v2428_v42  ;;  %v349_v38 = vmul.f32 %v347_v49, %v2428_v42  ;;  %v351_v46 = vmul.f32 %v347_v49, %v2410_v43 }
  0xc1   :  { %v428_v53 = vpop.permute.xlu0 %427 }
  0xc2   :  { %v357_v58 = vpop.permute.xlu1 %356  ;;  %v352_v19 = vadd.f32 %v348_v15, %v319_v56  ;;  %v353_v50 = vadd.f32 %v349_v38, %v320_v22 }
  0xc6   :  { %v359_v21 = vpop.permute.xlu1 %358 }
  0xc7   :  { %v361_v59 = vsel %vm360_vm7, %v357_v58, %v359_v21  ;;  %v362_v40 = vsel %vm360_vm7, %v359_v21, %v357_v58  ;;  %v350_v58 = vmul.f32 %v343_v45, %v2410_v43  ;;  %v355_v21 = vadd.f32 %v351_v46, %v322_v12 }
  0xc8   :  { %v363_v62 = vmul.f32 %v2455_v8, %v361_v59  ;;  %v364_v41 = vmul.f32 %v2460_v11, %v362_v40 }
  0xc9   :  { %v354_v23 = vadd.f32 %v350_v58, %v321_v14 }
  0xca   :  { %v376_v16 = vrot.slane %v363_v62, %v2141_v7  ;;  %v380_v51 = vrot.slane %v364_v41, %v2141_v7  ;;  %v404_v24 = vpop.permute.xlu1 %403 }
  0xcc   :  { %v381_v13 = vmul.f32 %v376_v16, %v2479_v39  ;;  %v382_v18 = vmul.f32 %v380_v51, %v2479_v39  ;;  %v383_v28 = vmul.f32 %v376_v16, %v371_v57  ;;  %v384_v20 = vmul.f32 %v380_v51, %v371_v57 }
  0xce   :  { %v390_v25 = vpop.permute.xlu1 %389  ;;  %v385_v57 = vadd.f32 %v381_v13, %v352_v19  ;;  %v386_v59 = vadd.f32 %v382_v18, %v353_v50  ;;  %v387_v40 = vadd.f32 %v383_v28, %v354_v23  ;;  %v388_v2 = vadd.f32 %v384_v20, %v355_v21  ;;  %v2635_v13 = vld [vmem:[%s2950_s1 + $0x8] sm:$0xff]  ;;  %v2649_v28 = vld [vmem:[%s2950_s1 + $0x10] sm:$0xff]  ;;  %v2656_v20 = vld [vmem:[%s2950_s1 + $0x18] sm:$0xff] }
  0xcf   :  { %v394_v61 = vsel %vm393_vm8, %v390_v25, %v392_v33  ;;  %v395_v42 = vsel %vm393_vm8, %v392_v33, %v390_v25  ;;  %v2097_v18 = vmov 11   ;;  %v2640_v33 = vld [vmem:[%s2950_s1] sm:$0xff]  ;;  %v2098_v25 = vmov 12  }
  0xd0   :  { %v396_v29 = vmul.f32 %v2536_v52, %v394_v61  ;;  %v397_v43 = vmul.f32 %v2539_v35, %v395_v42  ;;  %2031 = vset.pattern.permute.xlu1 %v2097_v18  ;;  %2030 = vset.pattern.permute.xlu0 %v2097_v18 }
  0xd2   :  { %v409_v39 = vrot.slane %v396_v29, %v2141_v7  ;;  %v413_v31 = vrot.slane %v397_v43, %v2141_v7  ;;  %v424_v37 = vpop.permute.xlu1 %423 }
  0xd4   :  { %v414_v10 = vmul.f32 %v409_v39, %v400_v47  ;;  %v415_v9 = vmul.f32 %v413_v31, %v400_v47  ;;  %v416_v62 = vmul.f32 %v409_v39, %v404_v24  ;;  %v417_v41 = vmul.f32 %v413_v31, %v404_v24 }
  0xd6   :  { %v418_v48 = vadd.f32 %v414_v10, %v385_v57  ;;  %v419_v30 = vadd.f32 %v415_v9, %v386_v59  ;;  %v420_v45 = vadd.f32 %v416_v62, %v387_v40  ;;  %v421_v49 = vadd.f32 %v417_v41, %v388_v2  ;;  %v2040_v62 = vld [vmem:[%s2952_s2 + $0x78] sm:$0xff]  }
  0xd7   :  { %v436_v60 = vpop.permute.xlu1 %435 }
  0xd8   :  { %v430_v16 = vmul.f32 %v424_v37, %v418_v48  ;;  %v431_v51 = vmul.f32 %v424_v37, %v419_v30  ;;  %v432_v7 = vmul.f32 %v428_v53, %v420_v45  ;;  %v433_v56 = vmul.f32 %v428_v53, %v421_v49 }
  0xd9   :  { %v2989_v49 = vmov 0  }
  0xda   :  { %v442_v54 = vadd.f32 %v436_v60, %v430_v16  ;;  %v443_v26 = vadd.f32 %v436_v60, %v431_v51  ;;  %v2041_v51 = vld [vmem:[%s2952_s2 + $0x80] sm:$0xff]  }
  0xdb   :  { %v440_v22 = vpop.permute.xlu1 %439 }
  0xdc   :  { %v2556_v15 = vmax.f32 %v442_v54, 0.0  ;;  %v444_v38 = vadd.f32 %v440_v22, %v432_v7  ;;  %v445_v58 = vadd.f32 %v440_v22, %v433_v56  ;;  %v2558_v47 = vmax.f32 %v443_v26, 0.0 }
  0xde   :  { %v2560_v24 = vmax.f32 %v444_v38, 0.0  ;;  %v2562_v46 = vmax.f32 %v445_v58, 0.0  ;;  %732 = vrot.lane.b32.xlu0 %v2556_v15, %s2084_s20 }
  0xe0   :  { %734 = vrot.lane.b32.xlu1 %v2560_v24, %s2084_s20  ;;  %v832_v14 = vpack.c.bf16 %v2562_v46, %v2558_v47  ;;  %v831_v12 = vpack.c.bf16 %v2560_v24, %v2556_v15 }
  0xe2   :  { %736 = vrot.lane.b32.xlu0 %v2558_v47, %s2084_s20 }
  0xe4   :  { %738 = vrot.lane.b32.xlu1 %v2562_v46, %s2084_s20 }
  0xe6   :  { %914 = vrot.lane.b32.xlu0 %v2556_v15, %s2090_s22 }
  0xe8   :  { %916 = vrot.lane.b32.xlu1 %v2560_v24, %s2090_s22 }
  0xea   :  { %918 = vrot.lane.b32.xlu0 %v2558_v47, %s2090_s22 }
  0xec   :  { %920 = vrot.lane.b32.xlu1 %v2562_v46, %s2090_s22 }
  0xee   :  { %472 = vrot.lane.b32.xlu0 %v2556_v15, %s2081_s0 }
  0xf0   :  { %474 = vrot.lane.b32.xlu1 %v2560_v24, %s2081_s0 }
  0xf2   :  { %476 = vrot.lane.b32.xlu0 %v2558_v47, %s2081_s0 }
  0xf4   :  { %478 = vrot.lane.b32.xlu1 %v2562_v46, %s2081_s0 }
  0xf6   :  { %1013 = vrot.lane.b32.xlu0 %v2556_v15, %s2088_s21 }
  0xf8   :  { %1015 = vrot.lane.b32.xlu1 %v2560_v24, %s2088_s21 }
  0xfa   :  { %1017 = vrot.lane.b32.xlu0 %v2558_v47, %s2088_s21 }
  0xfc   :  { %1019 = vrot.lane.b32.xlu1 %v2562_v46, %s2088_s21 }
  0xfe   :  { %450 = vrot.lane.b32.xlu0 %v2556_v15, %s2079_s18 }
 0x100   :  { %452 = vrot.lane.b32.xlu1 %v2560_v24, %s2079_s18 }
 0x102   :  { %454 = vrot.lane.b32.xlu0 %v2558_v47, %s2079_s18 }
 0x104   :  { %456 = vrot.lane.b32.xlu1 %v2562_v46, %s2079_s18 }
 0x106   :  { %1112 = vrot.lane.b32.xlu0 %v2556_v15, %s2094_s24 }
 0x108   :  { %1114 = vrot.lane.b32.xlu1 %v2560_v24, %s2094_s24 }
 0x10a   :  { %1116 = vrot.lane.b32.xlu0 %v2558_v47, %s2094_s24 }
 0x10c   :  { %1118 = vrot.lane.b32.xlu1 %v2562_v46, %s2094_s24 }
 0x10e   :  { %633 = vrot.lane.b32.xlu0 %v2556_v15, %s2082_s19 }
 0x110   :  { %635 = vrot.lane.b32.xlu1 %v2560_v24, %s2082_s19 }
 0x112   :  { %637 = vrot.lane.b32.xlu0 %v2558_v47, %s2082_s19 }
 0x114   :  { %639 = vrot.lane.b32.xlu1 %v2562_v46, %s2082_s19 }
 0x116   :  { %1211 = vrot.lane.b32.xlu0 %v2556_v15, %s2092_s23 }
 0x118   :  { %1213 = vrot.lane.b32.xlu1 %v2560_v24, %s2092_s23 }
 0x11a   :  { %1215 = vrot.lane.b32.xlu0 %v2558_v47, %s2092_s23 }
 0x11c   :  { %1217 = vrot.lane.b32.xlu1 %v2562_v46, %s2092_s23 }
 0x11e   :  { %1316 = vperm.xlu0 %2030, %v2640_v33  }
 0x120   :  { %1321 = vperm.xlu1 %2031, %v2635_v13  }
 0x122   :  { %2033 = vset.pattern.permute.xlu0 %v2098_v25 }
 0x123   :  { %1347 = vperm.xlu0 %2033, %v2635_v13  }
 0x124   :  { %2032 = vset.pattern.permute.xlu1 %v2098_v25 }
 0x125   :  { %1343 = vperm.xlu1 %2032, %v2640_v33  }
 0x127   :  { %1351 = vperm.xlu0 %2033, %v2649_v28  }
 0x129   :  { %2034 = vset.pattern.permute.xlu1 %v2097_v18 }
 0x12a   :  { %1326 = vperm.xlu1 %2034, %v2649_v28  }
 0x12e   :  { %1331 = vperm.xlu1 %2034, %v2656_v20  }
 0x132   :  { %2035 = vset.pattern.permute.xlu1 %v2098_v25 }
 0x133   :  { %1355 = vperm.xlu1 %2035, %v2656_v20  }
 0x150   :  { %v733_v61 = vpop.permute.xlu0 %732 }
 0x152   :  { %v735_v42 = vpop.permute.xlu1 %734 }
 0x154   :  { %v737_v29 = vpop.permute.xlu0 %736 }
 0x155   :  { %v740_v43 = vsel %vm245_vm3, %v733_v61, %v737_v29  ;;  %v742_v19 = vsel %vm245_vm3, %v737_v29, %v733_v61 }
 0x156   :  { %v739_v50 = vpop.permute.xlu1 %738  ;;  %v744_v39 = vmul.f32 %v2385_v32, %v742_v19  ;;  %v745_v57 = vmul.f32 %v2390_v34, %v740_v43 }
 0x157   :  { %v741_v23 = vsel %vm245_vm3, %v735_v42, %v739_v50  ;;  %v743_v21 = vsel %vm245_vm3, %v739_v50, %v735_v42  ;;  %vm2990_vm3 = vcmp.lt.s32.totalorder %v2213_v27, 8 }
 0x158   :  { %v746_v31 = vmul.f32 %v2385_v32, %v743_v21  ;;  %v915_v37 = vpop.permute.xlu0 %914  ;;  %v747_v59 = vmul.f32 %v2390_v34, %v741_v23  ;;  %vm2991_vm14 = vmmov %vm2990_vm3 }
 0x159   :  { %vm2992_vm0 = vmmov %vm2990_vm3 }
 0x15a   :  { %v917_v40 = vpop.permute.xlu1 %916  ;;  %v749_v2 = vpack.c.bf16 %v747_v59, %v745_v57  ;;  %v748_v10 = vpack.c.bf16 %v746_v31, %v744_v39  ;;  %vm2993_vm4 = vmmov %vm2992_vm0  ;;  %v2044_v57 = vld [vmem:[%s2952_s2 + $0x60] sm:$0xff]  }
 0x15c   :  { %770 = vmatprep.subr.bf16.mxu0 %v749_v2  ;;  %v919_v9 = vpop.permute.xlu0 %918 }
 0x15d   :  { %v924_v41 = vsel %vm294_vm10, %v919_v9, %v915_v37  ;;  %771 = vmatpush1.bf16.msra.mxu0 %v748_v10  ;;  %v922_v46 = vsel %vm294_vm10, %v915_v37, %v919_v9 }
 0x15e   :  { %v921_v32 = vpop.permute.xlu1 %920  ;;  %853 = vmatprep.subr.bf16.mxu0 %v832_v14  ;;  %v927_v48 = vmul.f32 %v2437_v55, %v924_v41  ;;  %v926_v42 = vmul.f32 %v2425_v36, %v922_v46  ;;  %v2048_v46 = vld [vmem:[%s2952_s2 + $0x50] sm:$0xff]  }
 0x15f   :  { %v925_v34 = vsel %vm294_vm10, %v921_v32, %v917_v40  ;;  %v923_v7 = vsel %vm294_vm10, %v917_v40, %v921_v32  ;;  %vm2997_vm10 = vmmov %vm2994_vm2 }
 0x160   :  { %v929_v30 = vmul.f32 %v2437_v55, %v925_v34  ;;  %1822 = vmatmul.mubr.msk.bf16.vlgmr.msra.gmra.mrb[0].mxu0 %vm504_vm15, %v2040_v62  ;;  %v473_v45 = vpop.permute.xlu0 %472  ;;  %v928_v25 = vmul.f32 %v2425_v36, %v923_v7 }
 0x161   :  { %854 = vmatpush1.bf16.msra.mxu0 %v831_v12  ;;  %812 = vmatprep.mubr.bf16.mxu0 %v2989_v49 }
 0x162   :  { %v475_v60 = vpop.permute.xlu1 %474  ;;  %v931_v53 = vpack.c.bf16 %v929_v30, %v927_v48  ;;  %v930_v19 = vpack.c.bf16 %v928_v25, %v926_v42 }
 0x164   :  { %952 = vmatprep.subr.bf16.mxu0 %v931_v53  ;;  %v477_v16 = vpop.permute.xlu0 %476 }
 0x165   :  { %v480_v55 = vsel %vm2990_vm3, %v473_v45, %v477_v16  ;;  %v482_v54 = vsel %vm2991_vm14, %v477_v16, %v473_v45 }
 0x166   :  { %v479_v26 = vpop.permute.xlu1 %478  ;;  %v484_v15 = vmul.f32 %v2293_v63, %v482_v54  ;;  %v485_v47 = vmul.f32 %v2298_v0, %v480_v55  ;;  %v2047_v55 = vld [vmem:[%s2952_s2 + $0x98] sm:$0xff]  }
 0x167   :  { %v481_v56 = vsel %vm2992_vm0, %v475_v60, %v479_v26  ;;  %v483_v22 = vsel %vm2993_vm4, %v479_v26, %v475_v60 }
 0x168   :  { %v486_v38 = vmul.f32 %v2293_v63, %v483_v22  ;;  %1823 = vmatmul.mubr.msk.bf16.gmra.mrb[4].mxu0 %vm504_vm15, %v2041_v51  ;;  %v1014_v58 = vpop.permute.xlu0 %1013  ;;  %v487_v24 = vmul.f32 %v2298_v0, %v481_v56  ;;  %v2042_v63 = vld [vmem:[%s2952_s2 + $0x58] sm:$0xff]   ;;  %v2043_v0 = vld [vmem:[%s2952_s2 + $0x88] sm:$0xff]  }
 0x169   :  { %885 = vmatprep.mubr.bf16.mxu0 %v2989_v49 }
 0x16a   :  { %v1016_v14 = vpop.permute.xlu1 %1015  ;;  %v489_v12 = vpack.c.bf16 %v487_v24, %v485_v47  ;;  %v488_v18 = vpack.c.bf16 %v486_v38, %v484_v15 }
 0x16c   :  { %511 = vmatprep.subr.bf16.mxu1 %v489_v12  ;;  %v1018_v61 = vpop.permute.xlu0 %1017 }
 0x16d   :  { %v1023_v29 = vsel %vm327_vm12, %v1018_v61, %v1014_v58  ;;  %512 = vmatpush1.bf16.msra.mxu1 %v488_v18  ;;  %v1021_v45 = vsel %vm327_vm12, %v1014_v58, %v1018_v61 }
 0x16e   :  { %v1020_v43 = vpop.permute.xlu1 %1019  ;;  %v1026_v23 = vmul.f32 %v2450_v6, %v1023_v29  ;;  %v1025_v54 = vmul.f32 %v2447_v1, %v1021_v45  ;;  %v2055_v45 = vld [vmem:[%s2952_s2 + $0xc0] sm:$0xff]  }
 0x16f   :  { %v1024_v50 = vsel %vm327_vm12, %v1020_v43, %v1016_v14  ;;  %v1022_v10 = vsel %vm327_vm12, %v1016_v14, %v1020_v43  ;;  %vm1382_vm12 = vcmp.eq.s32.totalorder %v2213_v27, 0 }
 0x170   :  { %v1028_v21 = vmul.f32 %v2450_v6, %v1024_v50  ;;  %1810 = vmatmul.mubr.msk.bf16.vlgmr.msra.gmra.mrb[0].mxu1 %vm504_vm15, %v2042_v63  ;;  %1826 = vmatmul.mubr.msk.bf16.vlgmr.msra.gmra.mrb[0].mxu0 %vm504_vm15, %v2043_v0  ;;  %v451_v39 = vpop.permute.xlu0 %450  ;;  %v2045_v6 = vld [vmem:[%s2952_s2 + $0x90] sm:$0xff]   ;;  %v1027_v51 = vmul.f32 %v2447_v1, %v1022_v10 }
 0x171   :  { %953 = vmatpush1.bf16.msra.mxu0 %v930_v19  ;;  %553 = vmatprep.mubr.bf16.mxu1 %v2989_v49 }
 0x172   :  { %v453_v36 = vpop.permute.xlu1 %452  ;;  %v1030_v31 = vpack.c.bf16 %v1028_v21, %v1026_v23  ;;  %895 = vmatprep.mubr.bf16.mxu0 %v2989_v49  ;;  %v1029_v56 = vpack.c.bf16 %v1027_v51, %v1025_v54 }
 0x174   :  { %1051 = vmatprep.subr.bf16.mxu0 %v1030_v31  ;;  %v455_v37 = vpop.permute.xlu0 %454  ;;  %v2051_v31 = vld [vmem:[%s2952_s2 + $0xa8] sm:$0xff]  }
 0x175   :  { %v458_v59 = vsel %vm2994_vm2, %v451_v39, %v455_v37  ;;  %v460_v40 = vsel %vm2995_vm9, %v455_v37, %v451_v39 }
 0x176   :  { %v457_v2 = vpop.permute.xlu1 %456  ;;  %v462_v9 = vmul.f32 %v2307_v3, %v460_v40  ;;  %v463_v32 = vmul.f32 %v2312_v4, %v458_v59 }
 0x177   :  { %v459_v62 = vsel %vm2996_vm6, %v453_v36, %v457_v2  ;;  %v461_v41 = vsel %vm2997_vm10, %v457_v2, %v453_v36 }
 0x178   :  { %v464_v34 = vmul.f32 %v2307_v3, %v461_v41  ;;  %v465_v48 = vmul.f32 %v2312_v4, %v459_v62  ;;  %1811 = vmatmul.mubr.msk.bf16.gmra.mrb[4].mxu1 %vm504_vm15, %v2044_v57  ;;  %1827 = vmatmul.mubr.msk.bf16.gmra.mrb[4].mxu0 %vm504_vm15, %v2045_v6  ;;  %v1113_v30 = vpop.permute.xlu0 %1112  ;;  %v2046_v4 = vld [vmem:[%s2952_s2 + $0x48] sm:$0xff]   ;;  %v2053_v62 = vld [vmem:[%s2952_s2 + $0xb0] sm:$0xff]  }
 0x179   :  { %612 = vmatprep.mubr.bf16.mxu1 %v2989_v49  ;;  %984 = vmatprep.mubr.bf16.mxu0 %v2989_v49 }
 0x17a   :  { %v466_v60 = vpack.c.bf16 %v464_v34, %v462_v9  ;;  %v1115_v53 = vpop.permute.xlu1 %1114  ;;  %v467_v16 = vpack.c.bf16 %v465_v48, %v463_v32  ;;  %v2052_v9 = vld [vmem:[%s2952_s2 + $0x70] sm:$0xff]   ;;  %v2054_v34 = vld [vmem:[%s2952_s2 + $0xb8] sm:$0xff]  }
 0x17c   :  { %580 = vmatprep.subr.bf16.mxu1 %v467_v16  ;;  %v1117_v3 = vpop.permute.xlu0 %1116 }
 0x17d   :  { %v1122_v26 = vsel %vm360_vm7, %v1117_v3, %v1113_v30  ;;  %581 = vmatpush1.bf16.msra.mxu1 %v466_v60  ;;  %v1120_v50 = vsel %vm360_vm7, %v1113_v30, %v1117_v3  ;;  %v2056_v60 = vld [vmem:[%s2952_s2 + $0xc8] sm:$0xff]  }
 0x17e   :  { %v1119_v7 = vpop.permute.xlu1 %1118  ;;  %v1125_v15 = vmul.f32 %v2460_v11, %v1122_v26  ;;  %v1124_v37 = vmul.f32 %v2455_v8, %v1120_v50 }
 0x17f   :  { %v1123_v22 = vsel %vm360_vm7, %v1119_v7, %v1115_v53  ;;  %v1121_v25 = vsel %vm360_vm7, %v1115_v53, %v1119_v7  ;;  %vm2100_vm7 = vmmov 0  }
 0x180   :  { %v1127_v38 = vmul.f32 %v2460_v11, %v1123_v22  ;;  %1814 = vmatmul.mubr.msk.bf16.vlgmr.msra.gmra.mrb[0].mxu1 %vm504_vm15, %v2046_v4  ;;  %1830 = vmatmul.mubr.msk.bf16.vlgmr.msra.gmra.mrb[0].mxu0 %vm504_vm15, %v2047_v55  ;;  %v634_v58 = vpop.permute.xlu0 %633  ;;  %v2049_v11 = vld [vmem:[%s2952_s2 + $0xa0] sm:$0xff]   ;;  %v1126_v36 = vmul.f32 %v2455_v8, %v1121_v25 }
 0x181   :  { %1052 = vmatpush1.bf16.msra.mxu0 %v1029_v56  ;;  %622 = vmatprep.mubr.bf16.mxu1 %v2989_v49 }
 0x182   :  { %v636_v1 = vpop.permute.xlu1 %635  ;;  %v1129_v47 = vpack.c.bf16 %v1127_v38, %v1125_v15  ;;  %994 = vmatprep.mubr.bf16.mxu0 %v2989_v49  ;;  %v1128_v59 = vpack.c.bf16 %v1126_v36, %v1124_v37 }
 0x184   :  { %1150 = vmatprep.subr.bf16.mxu0 %v1129_v47  ;;  %v638_v24 = vpop.permute.xlu0 %637 }
 0x185   :  { %v641_v14 = vsel %vm212_vm11, %v634_v58, %v638_v24  ;;  %v643_v12 = vsel %vm212_vm11, %v638_v24, %v634_v58 }
 0x186   :  { %v640_v18 = vpop.permute.xlu1 %639  ;;  %v645_v61 = vmul.f32 %v2321_v5, %v643_v12  ;;  %v646_v42 = vmul.f32 %v2355_v17, %v641_v14 }
 0x187   :  { %v642_v63 = vsel %vm212_vm11, %v636_v1, %v640_v18  ;;  %v644_v0 = vsel %vm212_vm11, %v640_v18, %v636_v1  ;;  %vm1570_vm11 = vcmask 261120  }
 0x188   :  { %v647_v29 = vmul.f32 %v2321_v5, %v644_v0  ;;  %v648_v43 = vmul.f32 %v2355_v17, %v642_v63  ;;  %1815 = vmatmul.mubr.msk.bf16.gmra.mrb[4].mxu1 %vm504_vm15, %v2048_v46  ;;  %1831 = vmatmul.mubr.msk.bf16.gmra.mrb[4].mxu0 %vm504_vm15, %v2049_v11  ;;  %v1212_v19 = vpop.permute.xlu0 %1211  ;;  %v2050_v17 = vld [vmem:[%s2952_s2 + $0x68] sm:$0xff]  }
 0x189   :  { %703 = vmatprep.mubr.bf16.mxu1 %v2989_v49  ;;  %1083 = vmatprep.mubr.bf16.mxu0 %v2989_v49 }
 0x18a   :  { %v649_v23 = vpack.c.bf16 %v647_v29, %v645_v61  ;;  %v1214_v21 = vpop.permute.xlu1 %1213  ;;  %v650_v39 = vpack.c.bf16 %v648_v43, %v646_v42 }
 0x18c   :  { %671 = vmatprep.subr.bf16.mxu1 %v650_v39  ;;  %v1216_v5 = vpop.permute.xlu0 %1215 }
 0x18d   :  { %v1221_v57 = vsel %vm393_vm8, %v1216_v5, %v1212_v19  ;;  %672 = vmatpush1.bf16.msra.mxu1 %v649_v23  ;;  %v1219_v41 = vsel %vm393_vm8, %v1212_v19, %v1216_v5 }
 0x18e   :  { %v1218_v6 = vpop.permute.xlu1 %1217  ;;  %v1224_v2 = vmul.f32 %v2539_v35, %v1221_v57  ;;  %v1223_v48 = vmul.f32 %v2536_v52, %v1219_v41 }
 0x18f   :  { %v1222_v40 = vsel %vm393_vm8, %v1218_v6, %v1214_v21 }
 0x190   :  { %v1226_v10 = vmul.f32 %v2539_v35, %v1222_v40  ;;  %1818 = vmatmul.mubr.msk.bf16.vlgmr.msra.gmra.mrb[0].mxu1 %vm504_vm15, %v2050_v17  ;;  %1834 = vmatmul.mubr.msk.bf16.vlgmr.msra.gmra.mrb[0].mxu0 %vm504_vm15, %v2051_v31  ;;  %v1220_v35 = vsel %vm393_vm8, %v1214_v21, %v1218_v6 }
 0x191   :  { %1151 = vmatpush1.bf16.msra.mxu0 %v1128_v59  ;;  %713 = vmatprep.mubr.bf16.mxu1 %v2989_v49  ;;  %v1225_v32 = vmul.f32 %v2536_v52, %v1220_v35  ;;  %v2057_v52 = vld [vmem:[%s2952_s2 + $0xd0] sm:$0xff]  }
 0x192   :  { %v1228_v8 = vpack.c.bf16 %v1226_v10, %v1224_v2  ;;  %1093 = vmatprep.mubr.bf16.mxu0 %v2989_v49 }
 0x193   :  { %v1227_v30 = vpack.c.bf16 %v1225_v32, %v1223_v48 }
 0x194   :  { %1249 = vmatprep.subr.bf16.mxu0 %v1228_v8 }
 0x198   :  { %1819 = vmatmul.mubr.msk.bf16.gmra.mrb[4].mxu1 %vm504_vm15, %v2052_v9  ;;  %1835 = vmatmul.mubr.msk.bf16.gmra.mrb[4].mxu0 %vm504_vm15, %v2053_v62 }
 0x199   :  { %1182 = vmatprep.mubr.bf16.mxu0 %v2989_v49 }
 0x19d   :  { %v1317_v22 = vpop.permute.xlu0 %1316 }
 0x19f   :  { %v1322_v7 = vpop.permute.xlu1 %1321 }
 0x1a0   :  { %1838 = vmatmul.mubr.msk.bf16.vlgmr.msra.gmra.mrb[0].mxu0 %vm504_vm15, %v2054_v34 }
 0x1a1   :  { %1250 = vmatpush1.bf16.msra.mxu0 %v1227_v30  ;;  %1192 = vmatprep.mubr.bf16.mxu0 %v2989_v49 }
 0x1a2   :  { %v1348_v18 = vpop.permute.xlu0 %1347 }
 0x1a4   :  { %v1344_v56 = vpop.permute.xlu1 %1343 }
 0x1a6   :  { %v1352_v17 = vpop.permute.xlu0 %1351 }
 0x1a8   :  { %1839 = vmatmul.mubr.msk.bf16.gmra.mrb[4].mxu0 %vm504_vm15, %v2055_v45 }
 0x1a9   :  { %1281 = vmatprep.mubr.bf16.mxu0 %v2989_v49  ;;  %v1327_v47 = vpop.permute.xlu1 %1326 }
 0x1ad   :  { %v1332_v43 = vpop.permute.xlu1 %1331 }
 0x1b0   :  { %1842 = vmatmul.mubr.msk.bf16.vlgmr.msra.gmra.mrb[0].mxu0 %vm504_vm15, %v2056_v60  ;;  %v2058_v60 = vld [vmem:[%s2952_s2 + $0x8] sm:$0xff]  }
 0x1b1   :  { %1291 = vmatprep.mubr.bf16.mxu0 %v2989_v49  ;;  %1886 = vmatprep.mubr.msk.bf16.mxu1 %vm1570_vm11, %v2058_v60 }
 0x1b2   :  { %v1356_v2 = vpop.permute.xlu1 %1355 }
 0x1b8   :  { %1843 = vmatmul.mubr.msk.bf16.gmra.mrb[4].mxu0 %vm504_vm15, %v2057_v52  ;;  %v2099_v52 = vmov 13  }
 0x1b9   :  { %2036 = vset.pattern.permute.xlu1 %v2099_v52  ;;  %2037 = vset.pattern.permute.xlu0 %v2099_v52 }
 0x263   :  { %v705_v53 = vpop.f32.mrb[0].mxu1 }
 0x264   :  { %v707_v16 = vpop.f32.mrb[1].mxu1 }
 0x265   :  { %v709_v51 = vpop.f32.mrb[2].mxu1 }
 0x266   :  { %v711_v3 = vpop.f32.mrb[3].mxu1 }
 0x26b   :  { %v715_v4 = vpop.f32.mrb[4].mxu1 }
 0x26c   :  { %v717_v55 = vpop.f32.mrb[5].mxu1 }
 0x26d   :  { %v719_v54 = vpop.f32.mrb[6].mxu1 }
 0x26e   :  { %v721_v26 = vpop.f32.mrb[7].mxu1 }
 0x283   :  { %v1283_v15 = vpop.f32.mrb[0].mxu0 }
 0x284   :  { %v1922_v38 = vadd.f32 %v1283_v15, %v705_v53  ;;  %v1285_v49 = vpop.f32.mrb[1].mxu0  ;;  %v1442_v53 = vld [vmem:[%s2950_s1 + $0x50] sm:$0xff] }
 0x285   :  { %v1923_v58 = vadd.f32 %v1285_v49, %v707_v16  ;;  %v1287_v1 = vpop.f32.mrb[2].mxu0  ;;  %v1444_v16 = vld [vmem:[%s2950_s1 + $0x60] sm:$0xff] }
 0x286   :  { %v1924_v24 = vadd.f32 %v1287_v1, %v709_v51  ;;  %v1334_v46 = vmul.f32 %v1922_v38, %v1317_v22  ;;  %v1289_v11 = vpop.f32.mrb[3].mxu0  ;;  %v1439_v51 = vld [vmem:[%s2950_s1 + $0x38] sm:$0xff] }
 0x287   :  { %v1335_v14 = vmul.f32 %v1923_v58, %v1317_v22  ;;  %v1925_v12 = vadd.f32 %v1289_v11, %v711_v3  ;;  %v1440_v3 = vld [vmem:[%s2950_s1 + $0x40] sm:$0xff]  ;;  %v1844_v22 = vsel %vm1382_vm12, 1.0, %v2988_v44 }
 0x288   :  { %v1336_v25 = vmul.f32 %v1924_v24, %v1322_v7  ;;  %v1358_v61 = vadd.f32 %v1344_v56, %v1334_v46 }
 0x289   :  { %v1337_v63 = vmul.f32 %v1925_v12, %v1322_v7  ;;  %v1359_v29 = vadd.f32 %v1344_v56, %v1335_v14  ;;  %v1845_v56 = vsel %vm1401_vm5, 1.0, %v2988_v44 }
 0x28a   :  { %v1360_v0 = vadd.f32 %v1348_v18, %v1336_v25  ;;  %v1366_v42 = vmax.f32 %v1358_v61, 0.0 }
 0x28b   :  { %v1293_v19 = vpop.f32.mrb[4].mxu0  ;;  %v1361_v39 = vadd.f32 %v1348_v18, %v1337_v63  ;;  %v1367_v6 = vmax.f32 %v1359_v29, 0.0 }
 0x28c   :  { %v1926_v50 = vadd.f32 %v1293_v19, %v715_v4  ;;  %v1295_v23 = vpop.f32.mrb[5].mxu0  ;;  %1374 = vadd.xlane.f32.xlu0 %v1366_v42  ;;  %v1368_v21 = vmax.f32 %v1360_v0, 0.0  ;;  %v1441_v4 = vld [vmem:[%s2950_s1 + $0x48] sm:$0xff] }
 0x28d   :  { %v1927_v36 = vadd.f32 %v1295_v23, %v717_v55  ;;  %v1297_v5 = vpop.f32.mrb[6].mxu0  ;;  %v1369_v9 = vmax.f32 %v1361_v39, 0.0  ;;  %v1443_v55 = vld [vmem:[%s2950_s1 + $0x58] sm:$0xff] }
 0x28e   :  { %v1338_v31 = vmul.f32 %v1926_v50, %v1327_v47  ;;  %v1928_v37 = vadd.f32 %v1297_v5, %v719_v54  ;;  %v1299_v57 = vpop.f32.mrb[7].mxu0  ;;  %1376 = vadd.xlane.f32.xlu1 %v1368_v21  ;;  %v1445_v54 = vld [vmem:[%s2950_s1 + $0x68] sm:$0xff]  ;;  %v2060_v5 = vld [vmem:[%s2952_s2 + $0x18] sm:$0xff]  }
 0x28f   :  { %v1339_v59 = vmul.f32 %v1927_v36, %v1327_v47  ;;  %v1929_v40 = vadd.f32 %v1299_v57, %v721_v26  ;;  %v1447_v26 = vld [vmem:[%s2950_s1 + $0x78] sm:$0xff]  ;;  %v2059_v36 = vld [vmem:[%s2952_s2 + $0x10] sm:$0xff]  }
 0x290   :  { %v1340_v10 = vmul.f32 %v1928_v37, %v1332_v43  ;;  %v1362_v8 = vadd.f32 %v1352_v17, %v1338_v31  ;;  %1393 = vadd.xlane.f32.xlu0 %v1367_v6  ;;  %v2062_v31 = vld [vmem:[%s2952_s2 + $0x28] sm:$0xff]   ;;  %v2063_v37 = vld [vmem:[%s2952_s2 + $0x30] sm:$0xff]   ;;  %v2064_v57 = vld [vmem:[%s2952_s2 + $0x38] sm:$0xff]  }
 0x291   :  { %v1341_v62 = vmul.f32 %v1929_v40, %v1332_v43  ;;  %v1363_v35 = vadd.f32 %v1352_v17, %v1339_v59  ;;  %v2061_v17 = vld [vmem:[%s2952_s2 + $0x20] sm:$0xff]   ;;  %v2101_v59 = vmov 14  }
 0x292   :  { %v1364_v41 = vadd.f32 %v1356_v2, %v1340_v10  ;;  %v1370_v32 = vmax.f32 %v1362_v8, 0.0  ;;  %v2065_v6 = vld [vmem:[%s2952_s2 + $0x40] sm:$0xff]  }
 0x293   :  { %v1365_v34 = vadd.f32 %v1356_v2, %v1341_v62  ;;  %v1371_v30 = vmax.f32 %v1363_v35, 0.0  ;;  %v2075_v40 = vld [vmem:[%s2950_s1] sm:$0xff]  ;;  %v2076_v2 = vld [vmem:[%s2950_s1 + $0x8] sm:$0xff] }
 0x294   :  { %1395 = vadd.xlane.f32.xlu0 %v1369_v9  ;;  %1378 = vadd.xlane.f32.xlu1 %v1370_v32  ;;  %v1372_v48 = vmax.f32 %v1364_v41, 0.0 }
 0x295   :  { %v1373_v45 = vmax.f32 %v1365_v34, 0.0 }
 0x298   :  { %1380 = vadd.xlane.f32.xlu0 %v1372_v48  ;;  %1397 = vadd.xlane.f32.xlu1 %v1371_v30 }
 0x29c   :  { %1399 = vadd.xlane.f32.xlu0 %v1373_v45 }
 0x2a9   :  { %1452 = vperm.xlu1 %2036, %v2640_v33   ;;  %v1436_v33 = vld [vmem:[%s2950_s1 + $0x20] sm:$0xff] }
 0x2ad   :  { %1462 = vperm.xlu1 %2036, %v2649_v28   ;;  %v1437_v28 = vld [vmem:[%s2950_s1 + $0x28] sm:$0xff] }
 0x2b1   :  { %1467 = vperm.xlu1 %2036, %v2656_v20   ;;  %v1438_v20 = vld [vmem:[%s2950_s1 + $0x30] sm:$0xff] }
 0x2b2   :  { %1457 = vperm.xlu0 %2037, %v2635_v13   ;;  %v1446_v13 = vld [vmem:[%s2950_s1 + $0x70] sm:$0xff] }
 0x2b5   :  { %1472 = vperm.xlu1 %2036, %v1436_v33  }
 0x2b6   :  { %1502 = vperm.xlu0 %2037, %v1442_v53  }
 0x2b9   :  { %1477 = vperm.xlu1 %2036, %v1437_v28  }
 0x2ba   :  { %1512 = vperm.xlu0 %2037, %v1444_v16  }
 0x2bd   :  { %1482 = vperm.xlu1 %2036, %v1438_v20  }
 0x2be   :  { %1522 = vperm.xlu0 %2037, %v1446_v13  }
 0x2c1   :  { %1487 = vperm.xlu1 %2036, %v1439_v51  }
 0x2c2   :  { %2038 = vset.pattern.permute.xlu0 %v2101_v59 }
 0x2c3   :  { %1719 = vperm.xlu0 %2038, %v2075_v40  }
 0x2c5   :  { %1492 = vperm.xlu1 %2036, %v1440_v3  }
 0x2c9   :  { %1497 = vperm.xlu1 %2036, %v1441_v4  }
 0x2cd   :  { %1507 = vperm.xlu1 %2036, %v1443_v55  }
 0x2d1   :  { %1517 = vperm.xlu1 %2036, %v1445_v54  }
 0x2d5   :  { %1527 = vperm.xlu1 %2036, %v1447_v26  }
 0x2d9   :  { %2039 = vset.pattern.permute.xlu1 %v2101_v59 }
 0x2da   :  { %1723 = vperm.xlu1 %2039, %v2076_v2  }
 0x319   :  { %v1375_v7 = vpop.xlane.xlu0 %1374 }
 0x31a   :  { %v1385_v58 = vmul.f32 %v1844_v22, %v1375_v7 }
 0x31b   :  { %v1377_v15 = vpop.xlane.xlu1 %1376 }
 0x31c   :  { %v1386_v24 = vmul.f32 %v1844_v22, %v1377_v15 }
 0x31d   :  { %v1394_v38 = vpop.xlane.xlu0 %1393 }
 0x31e   :  { %v1404_v49 = vmul.f32 %v1845_v56, %v1394_v38 }
 0x320   :  { %v1408_v46 = vadd.f32 %v1404_v49, %v1385_v58 }
 0x321   :  { %v1379_v1 = vpop.xlane.xlu1 %1378  ;;  %v1396_v47 = vpop.xlane.xlu0 %1395 }
 0x322   :  { %v1405_v11 = vmul.f32 %v1845_v56, %v1396_v47  ;;  %v1412_v25 = vmul.f32 0.0078125, %v1408_v46  ;;  %v1387_v27 = vmul.f32 %v1844_v22, %v1379_v1 }
 0x324   :  { %v1409_v14 = vadd.f32 %v1405_v11, %v1386_v24 }
 0x325   :  { %v1398_v12 = vpop.xlane.xlu1 %1397  ;;  %v1381_v18 = vpop.xlane.xlu0 %1380 }
 0x326   :  { %v1413_v61 = vmul.f32 0.0078125, %v1409_v14  ;;  %v1406_v63 = vmul.f32 %v1845_v56, %v1398_v12  ;;  %v1388_v43 = vmul.f32 %v1844_v22, %v1381_v18 }
 0x328   :  { %v1448_v0 = vpack.c.bf16 %v1413_v61, %v1412_v25  ;;  %v1410_v29 = vadd.f32 %v1406_v63, %v1387_v27 }
 0x329   :  { %v1400_v42 = vpop.xlane.xlu0 %1399  ;;  %v1453_v10 = vpop.permute.xlu1 %1452 }
 0x32a   :  { %v1407_v19 = vmul.f32 %v1845_v56, %v1400_v42  ;;  %1882 = vmatprep.subr.bf16.mxu1 %v1448_v0  ;;  %v1414_v23 = vmul.f32 0.0078125, %v1410_v29 }
 0x32b   :  { %1883 = vmatpush3.bf16.msra.mxu1 %v1448_v0 }
 0x32c   :  { %v1411_v50 = vadd.f32 %v1407_v19, %v1388_v43 }
 0x32d   :  { %v1463_v8 = vpop.permute.xlu1 %1462 }
 0x32e   :  { %v1415_v21 = vmul.f32 0.0078125, %v1411_v50 }
 0x330   :  { %v1449_v39 = vpack.c.bf16 %v1415_v21, %v1414_v23 }
 0x331   :  { %v1468_v9 = vpop.permute.xlu1 %1467  ;;  %v1458_v53 = vpop.permute.xlu0 %1457 }
 0x332   :  { %1884 = vmatprep.subr.bf16.mxu1 %v1449_v39 }
 0x333   :  { %1885 = vmatpush3.bf16.msra.mxu1 %v1449_v39 }
 0x334   :  { %1902 = vmatprep.subr.bf16.mxu1 %v2988_v44 }
 0x335   :  { %v1473_v62 = vpop.permute.xlu1 %1472  ;;  %v1503_v58 = vpop.permute.xlu0 %1502 }
 0x336   :  { %1887 = vmatmul.mubr.msk.bf16.vlgmr.msra.gmra.mrb[8].mxu1 %vm1570_vm11, %v2059_v36 }
 0x337   :  { %1890 = vmatprep.mubr.msk.bf16.mxu1 %vm1570_vm11, %v2060_v5 }
 0x339   :  { %v1478_v35 = vpop.permute.xlu1 %1477  ;;  %v1513_v27 = vpop.permute.xlu0 %1512 }
 0x33d   :  { %v1483_v41 = vpop.permute.xlu1 %1482 }
 0x33e   :  { %1891 = vmatmul.mubr.msk.bf16.gmra.mrb[12].mxu1 %vm1570_vm11, %v2061_v17  ;;  %v1523_v17 = vpop.permute.xlu0 %1522 }
 0x33f   :  { %1894 = vmatprep.mubr.msk.bf16.mxu1 %vm1570_vm11, %v2062_v31 }
 0x341   :  { %v1488_v32 = vpop.permute.xlu1 %1487 }
 0x345   :  { %v1493_v45 = vpop.permute.xlu1 %1492 }
 0x346   :  { %1895 = vmatmul.mubr.msk.bf16.gmra.mrb[16].mxu1 %vm1570_vm11, %v2063_v37 }
 0x347   :  { %1898 = vmatprep.mubr.msk.bf16.mxu1 %vm1570_vm11, %v2064_v57 }
 0x349   :  { %v1498_v55 = vpop.permute.xlu1 %1497 }
 0x34d   :  { %v1508_v46 = vpop.permute.xlu1 %1507 }
 0x34e   :  { %1899 = vmatmul.mubr.msk.bf16.gmra.mrb[20].mxu1 %vm1570_vm11, %v2065_v6 }
 0x34f   :  { %1918 = vmatprep.mubr.msk.bf16.mxu1 %vm2100_vm7, %v2988_v44 }
 0x351   :  { %v1518_v19 = vpop.permute.xlu1 %1517 }
 0x355   :  { %v1528_v59 = vpop.permute.xlu1 %1527 }
 0x409   :  { %v1888_v34 = vpop.f32.mrb[8].mxu1 }
 0x40a   :  { %v1638_v48 = vadd.f32 %v1888_v34, %v1463_v8  ;;  %v1629_v30 = vpop.f32.mrb[9].mxu1 }
 0x40b   :  { %v1630_v60 = vadd.f32 %v1629_v30, %v1453_v10  ;;  %v1889_v52 = vpop.f32.mrb[10].mxu1  ;;  %v2066_v30 = vld [vmem:[%s2952_s2] sm:$0xff]  }
 0x40c   :  { %v1641_v16 = vadd.f32 %v1889_v52, %v1468_v9  ;;  %v1632_v33 = vpop.f32.mrb[11].mxu1  ;;  %v1694_v28 = vmax.f32 %v1638_v48, 0.0  ;;  %v1724_v52 = vpop.permute.xlu1 %1723 }
 0x40d   :  { %v1633_v13 = vadd.f32 %v1632_v33, %v1458_v53  ;;  %v1692_v51 = vmax.f32 %v1630_v60, 0.0 }
 0x40e   :  { %v1695_v20 = vmax.f32 %v1641_v16, 0.0 }
 0x40f   :  { %v1693_v3 = vmax.f32 %v1633_v13, 0.0 }
 0x410   :  { %v1711_v4 = vpack.c.bf16 %v1695_v20, %v1694_v28 }
 0x411   :  { %v1710_v54 = vpack.c.bf16 %v1693_v3, %v1692_v51  ;;  %v1892_v26 = vpop.f32.mrb[12].mxu1 }
 0x412   :  { %v1654_v7 = vadd.f32 %v1892_v26, %v1483_v41  ;;  %v1645_v56 = vpop.f32.mrb[13].mxu1 }
 0x413   :  { %v1646_v22 = vadd.f32 %v1645_v56, %v1473_v62  ;;  %v1893_v15 = vpop.f32.mrb[14].mxu1  ;;  %1903 = vmatpush3.bf16.msra.mxu1 %v1710_v54 }
 0x414   :  { %v1657_v38 = vadd.f32 %v1893_v15, %v1488_v32  ;;  %v1648_v49 = vpop.f32.mrb[15].mxu1  ;;  %1904 = vmatprep.subr.bf16.mxu1 %v2988_v44  ;;  %v1698_v47 = vmax.f32 %v1654_v7, 0.0 }
 0x415   :  { %v1649_v1 = vadd.f32 %v1648_v49, %v1478_v35  ;;  %v1696_v11 = vmax.f32 %v1646_v22, 0.0 }
 0x416   :  { %v1699_v24 = vmax.f32 %v1657_v38, 0.0 }
 0x417   :  { %v1697_v14 = vmax.f32 %v1649_v1, 0.0  ;;  %1905 = vmatpush3.bf16.msra.mxu1 %v1711_v4 }
 0x418   :  { %v1713_v12 = vpack.c.bf16 %v1699_v24, %v1698_v47  ;;  %1906 = vmatprep.subr.bf16.mxu1 %v2988_v44 }
 0x419   :  { %v1712_v18 = vpack.c.bf16 %v1697_v14, %v1696_v11  ;;  %v1896_v25 = vpop.f32.mrb[16].mxu1 }
 0x41a   :  { %v1670_v61 = vadd.f32 %v1896_v25, %v1503_v58  ;;  %v1661_v63 = vpop.f32.mrb[17].mxu1 }
 0x41b   :  { %v1662_v0 = vadd.f32 %v1661_v63, %v1493_v45  ;;  %v1897_v42 = vpop.f32.mrb[18].mxu1  ;;  %1907 = vmatpush3.bf16.msra.mxu1 %v1712_v18  ;;  %v1720_v45 = vpop.permute.xlu0 %1719 }
 0x41c   :  { %v1673_v29 = vadd.f32 %v1897_v42, %v1508_v46  ;;  %v1664_v43 = vpop.f32.mrb[19].mxu1  ;;  %1908 = vmatprep.subr.bf16.mxu1 %v2988_v44  ;;  %v1702_v23 = vmax.f32 %v1670_v61, 0.0 }
 0x41d   :  { %v1665_v50 = vadd.f32 %v1664_v43, %v1498_v55  ;;  %v1700_v39 = vmax.f32 %v1662_v0, 0.0 }
 0x41e   :  { %v1703_v21 = vmax.f32 %v1673_v29, 0.0 }
 0x41f   :  { %v1701_v36 = vmax.f32 %v1665_v50, 0.0  ;;  %1909 = vmatpush3.bf16.msra.mxu1 %v1713_v12 }
 0x420   :  { %v1715_v5 = vpack.c.bf16 %v1703_v21, %v1702_v23  ;;  %1910 = vmatprep.subr.bf16.mxu1 %v2988_v44 }
 0x421   :  { %v1714_v31 = vpack.c.bf16 %v1701_v36, %v1700_v39  ;;  %v1900_v37 = vpop.f32.mrb[20].mxu1 }
 0x422   :  { %v1686_v57 = vadd.f32 %v1900_v37, %v1523_v17  ;;  %v1677_v6 = vpop.f32.mrb[21].mxu1 }
 0x423   :  { %v1678_v40 = vadd.f32 %v1677_v6, %v1513_v27  ;;  %v1901_v2 = vpop.f32.mrb[22].mxu1  ;;  %1911 = vmatpush3.bf16.msra.mxu1 %v1714_v31 }
 0x424   :  { %v1689_v10 = vadd.f32 %v1901_v2, %v1528_v59  ;;  %v1680_v8 = vpop.f32.mrb[23].mxu1  ;;  %1912 = vmatprep.subr.bf16.mxu1 %v2988_v44  ;;  %v1706_v62 = vmax.f32 %v1686_v57, 0.0 }
 0x425   :  { %v1681_v9 = vadd.f32 %v1680_v8, %v1518_v19  ;;  %v1704_v41 = vmax.f32 %v1678_v40, 0.0 }
 0x426   :  { %v1707_v35 = vmax.f32 %v1689_v10, 0.0 }
 0x427   :  { %v1705_v32 = vmax.f32 %v1681_v9, 0.0  ;;  %1913 = vmatpush3.bf16.msra.mxu1 %v1715_v5 }
 0x428   :  { %v1717_v34 = vpack.c.bf16 %v1707_v35, %v1706_v62  ;;  %1914 = vmatprep.subr.bf16.mxu1 %v2988_v44 }
 0x429   :  { %v1716_v48 = vpack.c.bf16 %v1705_v32, %v1704_v41 }
 0x42b   :  { %1915 = vmatpush3.bf16.msra.mxu1 %v1716_v48 }
 0x42c   :  { %1916 = vmatprep.subr.bf16.mxu1 %v2988_v44 }
 0x42f   :  { %1917 = vmatpush3.bf16.msra.mxu1 %v1717_v34 }
 0x432   :  { %1919 = vmatmul.mubr.bf16.vlgmr.msra.gmra.mrb[24].mxu1 %v2066_v30 }
 0x505   :  { %v1766_v60 = vpop.f32.mrb[24].mxu1 }
 0x506   :  { %v1920_v53 = vpop.f32.mrb[25].mxu1  ;;  %v1767_v16 = vadd.f32 %v1766_v60, %v1720_v45 }
 0x507   :  { %v1769_v33 = vpop.f32.mrb[26].mxu1 }
 0x508   :  { %v1770_v13 = vadd.f32 %v1769_v33, %v1724_v52  ;;  %v1921_v28 = vpop.f32.mrb[27].mxu1  ;;  %v1773_v20 = vsub.f32 0.0, %v1767_v16 }
 0x50a   :  { %v1774_v51 = vsub.f32 0.0, %v1770_v13  ;;  %v1775_v3 = vmul.f32 1.442695, %v1773_v20 }
 0x50c   :  { %v1777_v4 = vmul.f32 1.442695, %v1774_v51  ;;  %2067 = vpow2.f32 %v1775_v3 }
 0x50e   :  { %2069 = vpow2.f32 %v1777_v4 }
 0x516   :  { %v2068_v44 = vpop.eup %2067 }
 0x517   :  { %v1779_v55 = vadd.f32 1.0, %v2068_v44 }
 0x518   :  { %v2070_v54 = vpop.eup %2069 }
 0x519   :  { %v1780_v26 = vadd.f32 1.0, %v2070_v54  ;;  %2071 = vrcp.f32 %v1779_v55 }
 0x51b   :  { %2073 = vrcp.f32 %v1780_v26 }
 0x523   :  { %v2072_v7 = vpop.eup %2071 }
 0x524   :  { %1786 = vst.msk [vmem:[%s2953_s3] sm:$0xff] %vm1785_vm1, %v2072_v7 }
 0x525   :  { %v2074_v56 = vpop.eup %2073 }
 0x526   :  { %1787 = vst.msk [vmem:[%s2953_s3 + $0x8] sm:$0xff] %vm1785_vm1, %v2074_v56 }

</bundles_post_ra>
